<compile_context>
chip_gen: v7x
topology: tpu7x:2x2x1
jax: 0.10.0
libtpu: 0.0.40
codegen_flags: <defaults>
</compile_context>

<pallas_src>
import functools

import jax
import jax.numpy as jnp
from jax.experimental import pallas as pl
from jax.experimental.pallas import tpu as pltpu


def _round_up(x, m):
    return ((x + m - 1) // m) * m


def _netE_kernel(
    x_ref,       # (B, T, D_in)            f32   frames of the current chunk
    hc0_ref,     # (2, B, Hd)              f32   packed initial (h, c)
    We_ref,      # (D_in, E)               bf16  frame-encoder weight
    Wih_ref,     # (E, 4*Hd)               bf16  LSTM input-hidden weight
    Whh_ref,     # (Hd, 4*Hd)              bf16  LSTM hidden-hidden weight
    Wc_ref,      # (Hd, NC_PAD)            bf16  classifier weight (lane-padded)
    bias_ref,    # (1, E + 4*Hd + NC_PAD)  f32   packed [be | b_ih+b_hh | bc]
    f_ref,       # out (B, T, NC_PAD)      f32
    e_ref,       # out (B, T, E)           f32
    hcout_ref,   # out (2, B, Hd)          f32   packed final (h, c)
    gx_ref,      # scratch (B, T, 4*Hd)    f32   hoisted input-gate preacts
    hs_ref,      # scratch (B, T, Hd)      f32   per-step hidden states
    hc_ref,      # scratch (2, B, Hd)      f32   (h, c) carry across chunks
):
    B, T, D_in = x_ref.shape
    E = We_ref.shape[1]
    Hd = Whh_ref.shape[0]
    NC_PAD = Wc_ref.shape[1]

    chunk = pl.program_id(0)

    # ---- (h, c) carry lives in VMEM scratch across the chunk grid axis ----
    @pl.when(chunk == 0)
    def _():
        hc_ref[...] = hc0_ref[...]

    # ---- unpack packed biases (static lane slices, once per chunk) --------
    be = bias_ref[:, :E]
    b_lstm = bias_ref[:, E:E + 4 * Hd]
    bc = bias_ref[:, E + 4 * Hd:]

    # ---- frame encoder over ALL frames: e = relu(x @ We + be) -------------
    # fp32 -> bf16 cast happens here (VPU work hidden under the input DMA),
    # not as a separate XLA op in the wrapper.
    x_bt = x_ref[...].reshape(B * T, D_in).astype(jnp.bfloat16)
    e_bt = jnp.dot(x_bt, We_ref[...], preferred_element_type=jnp.float32)
    e_bt = jnp.maximum(e_bt + be, 0.0)                        # (B*T, E) f32
    e_ref[...] = e_bt.reshape(B, T, E)                        # batch-major, no transpose

    # ---- hoisted input-gate projection, kept batch-major (no swapaxes) ----
    gx = jnp.dot(e_bt.astype(jnp.bfloat16), Wih_ref[...],
                 preferred_element_type=jnp.float32) + b_lstm
    gx_ref[...] = gx.reshape(B, T, 4 * Hd)

    # ---- serial LSTM recurrence (PyTorch gate order i, f, g, o) -----------
    # Only h_prev @ Whh sits on the serial critical path; weight loaded once.
    Whh = Whh_ref[...]
    h_prev = hc_ref[0]
    c_prev = hc_ref[1]
    for t in range(T):                       # static unroll (T is small)
        gates = gx_ref[:, t, :] + jnp.dot(
            h_prev.astype(Whh.dtype), Whh, preferred_element_type=jnp.float32)
        # full-vreg activations, slice afterwards (2 EUP pushes, not 4 tiny ones)
        sig = jax.nn.sigmoid(gates)
        th = jnp.tanh(gates)
        i_g = sig[:, 0 * Hd:1 * Hd]
        f_g = sig[:, 1 * Hd:2 * Hd]
        g_g = th[:, 2 * Hd:3 * Hd]
        o_g = sig[:, 3 * Hd:4 * Hd]
        c_prev = f_g * c_prev + i_g * g_g
        h_prev = o_g * jnp.tanh(c_prev)
        hs_ref[:, t, :] = h_prev

    hc_ref[0] = h_prev
    hc_ref[1] = c_prev

    @pl.when(chunk == pl.num_programs(0) - 1)
    def _():
        hcout_ref[...] = hc_ref[...]

    # ---- classifier over all timesteps, already batch-major ---------------
    h_all = hs_ref[...].reshape(B * T, Hd).astype(jnp.bfloat16)
    logits = jnp.dot(h_all, Wc_ref[...], preferred_element_type=jnp.float32) + bc
    f_ref[...] = logits.reshape(B, T, NC_PAD)   # 128-lane dense, unmasked store


@functools.partial(jax.jit, static_argnames=("n_frame", "n_class"))
def _netE_call(x_btd, hc0, We, Wih, Whh, Wc, bias, *, n_frame, n_class):
    B, total_T, D_in = x_btd.shape
    T = n_frame
    n_chunks = total_T // T
    E = We.shape[1]
    Hd = Whh.shape[0]
    NC_PAD = Wc.shape[1]

    f_pad, e_out, hc_out = pl.pallas_call(
        _netE_kernel,
        grid_spec=pltpu.PrefetchScalarGridSpec(
            num_scalar_prefetch=0,
            grid=(n_chunks,),
            in_specs=[
                pl.BlockSpec((B, T, D_in), lambda c: (0, c, 0)),
                pl.BlockSpec((2, B, Hd), lambda c: (0, 0, 0)),
                # constant index maps -> weights DMA'd once, stay resident
                pl.BlockSpec((D_in, E), lambda c: (0, 0)),
                pl.BlockSpec((E, 4 * Hd), lambda c: (0, 0)),
                pl.BlockSpec((Hd, 4 * Hd), lambda c: (0, 0)),
                pl.BlockSpec((Hd, NC_PAD), lambda c: (0, 0)),
                pl.BlockSpec((1, E + 4 * Hd + NC_PAD), lambda c: (0, 0)),
            ],
            out_specs=[
                pl.BlockSpec((B, T, NC_PAD), lambda c: (0, c, 0)),
                pl.BlockSpec((B, T, E), lambda c: (0, c, 0)),
                pl.BlockSpec((2, B, Hd), lambda c: (0, 0, 0)),
            ],
            scratch_shapes=[
                pltpu.VMEM((B, T, 4 * Hd), jnp.float32),   # gx
                pltpu.VMEM((B, T, Hd), jnp.float32),       # per-step h
                pltpu.VMEM((2, B, Hd), jnp.float32),       # (h, c) carry
            ],
        ),
        out_shape=(
            jax.ShapeDtypeStruct((B, total_T, NC_PAD), jnp.float32),  # f (padded)
            jax.ShapeDtypeStruct((B, total_T, E), jnp.float32),       # e
            jax.ShapeDtypeStruct((2, B, Hd), jnp.float32),            # (h, c)
        ),
        compiler_params=pltpu.CompilerParams(
            dimension_semantics=("arbitrary",)),   # chunk axis carries (h, c)
    )(x_btd, hc0, We, Wih, Whh, Wc, bias)

    return f_pad[:, :, :n_class], e_out, hc_out


def _to_btd(x_ncdhw):
    """NCDHW [B, C, T, H, W] -> [B, T, C*H*W].  Free reshape only for C == 1."""
    B, C, T, H, W = x_ncdhw.shape
    assert C == 1, "NCDHW->[B,T,D] is only a free (and feature-order-correct) reshape for C == 1"
    return jnp.transpose(x_ncdhw, (0, 2, 1, 3, 4)).reshape(B, T, C * H * W)


def netE_forward(x_split, hidden, params, n_class):
    """Per-chunk netE: mirrors `f_split, e_split, hidden = netE(x_split, hidden)`."""
    x_btd = _to_btd(x_split)
    B, T, _ = x_btd.shape
    Hd = params["Whh"].shape[0]
    hc0 = jnp.zeros((2, B, Hd), jnp.float32) if hidden is None else hidden
    return _netE_call(x_btd, hc0, params["We"], params["Wih"], params["Whh"],
                      params["Wc"], params["bias"], n_frame=T, n_class=n_class)


class BaseModelPallas:
    """Minimal JAX/Pallas port of BaseModel's forward()."""

    def __init__(self, n_frame, in_dim, embed_dim, hidden_dim, n_class, key):
        self.n_frame = n_frame
        self.hidden_dim = hidden_dim
        self.n_class = n_class
        nc_pad = _round_up(max(n_class, 128), 128)
        k = jax.random.split(key, 7)
        s_e = 1.0 / jnp.sqrt(in_dim)
        s_h = 1.0 / jnp.sqrt(hidden_dim)
        s_i = 1.0 / jnp.sqrt(embed_dim)

        Wc = jax.random.normal(k[3], (hidden_dim, n_class), jnp.float32) * s_h
        Wc = jnp.pad(Wc, ((0, 0), (0, nc_pad - n_class)))  # lane-dense classifier

        be = jax.random.normal(k[4], (1, embed_dim), jnp.float32) * 0.01
        b_lstm = jax.random.normal(k[5], (1, 4 * hidden_dim), jnp.float32) * 0.01
        bc = jnp.zeros((1, nc_pad), jnp.float32).at[:, :n_class].set(
            jax.random.normal(k[6], (1, n_class), jnp.float32) * 0.01)

        # Weights bf16 (MXU operands); biases / carries stay f32 on all chips.
        self.params = {
            "We":  (jax.random.normal(k[0], (in_dim, embed_dim), jnp.float32)
                    * s_e).astype(jnp.bfloat16),
            "Wih": (jax.random.normal(k[1], (embed_dim, 4 * hidden_dim), jnp.float32)
                    * s_i).astype(jnp.bfloat16),
            "Whh": (jax.random.normal(k[2], (hidden_dim, 4 * hidden_dim), jnp.float32)
                    * s_h).astype(jnp.bfloat16),
            "Wc":  Wc.astype(jnp.bfloat16),
            "bias": jnp.concatenate([be, b_lstm, bc], axis=1),  # one DMA descriptor
        }
        self.hidden = None          # packed (2, B, Hd) array, or None
        self.seq_first = True

    def set_input(self, x_split):
        self.x_split = x_split

    def forward(self):
        if self.seq_first:
            self.hidden = None
        f_split, e_split, hc = netE_forward(self.x_split, self.hidden,
                                            self.params, self.n_class)
        self.f_split, self.e_split = f_split, e_split
        # .detach() analogue: stop_gradient; carry kept packed for the next chunk.
        self.hidden = jax.lax.stop_gradient(hc)
        return self.f_split, self.e_split, (self.hidden[0], self.hidden[1])

    def forward_video(self, x_ncdhw):
        """Whole-video path: all n_frame chunks fused into ONE pallas_call
        (chunk axis on the grid, (h, c) carried in VMEM scratch) — replicates
        the per-chunk forward() loop of BaseModel.learn/test in one launch."""
        x_btd = _to_btd(x_ncdhw)
        B, total_T, _ = x_btd.shape
        assert total_T % self.n_frame == 0
        hc0 = jnp.zeros((2, B, self.hidden_dim), jnp.float32)
        f, e, hc = _netE_call(x_btd, hc0, self.params["We"], self.params["Wih"],
                              self.params["Whh"], self.params["Wc"],
                              self.params["bias"],
                              n_frame=self.n_frame, n_class=self.n_class)
        return f, e, (hc[0], hc[1])


if __name__ == "__main__":
    key = jax.random.PRNGKey(0)
    k_model, k_data = jax.random.split(key)

    B, C, H, W = 2, 1, 16, 16
    T = 8                                   # n_frame (chunk length)
    n_chunks = 3
    in_dim = C * H * W                      # 256
    embed_dim, hidden_dim, n_class = 64, 32, 10

    model = BaseModelPallas(T, in_dim, embed_dim, hidden_dim, n_class, k_model)

    # full video as the dataloader would present it, then NCDHW like learn/test
    x_seq = jax.random.normal(k_data, (B, n_chunks * T, H, W), jnp.float32)
    x_ncdhw = jnp.transpose(x_seq[:, :, None, :, :], (0, 2, 1, 3, 4))  # [B,1,TT,H,W]

    # --- per-chunk forward() path (BaseModel.forward semantics) ------------
    f_chunks = []
    for i in range(n_chunks):
        model.seq_first = (i == 0)
        model.set_input(x_ncdhw[:, :, i * T:(i + 1) * T])
        f_split, e_split, hidden = model.forward()
        f_chunks.append(f_split)
    f_seq_chunked = jnp.concatenate(f_chunks, axis=1)

    # --- fused whole-video path: one pallas_call for all chunks ------------
    f_seq_fused, e_seq_fused, hidden_fused = model.forward_video(x_ncdhw)

    jax.block_until_ready((f_seq_chunked, f_seq_fused, e_seq_fused,
                           hidden, hidden_fused))

    assert f_split.shape == (B, T, n_class)
    assert e_split.shape == (B, T, embed_dim)
    assert hidden[0].shape == (B, hidden_dim) and hidden[1].shape == (B, hidden_dim)
    assert f_seq_fused.shape == (B, n_chunks * T, n_class)
    assert e_seq_fused.shape == (B, n_chunks * T, embed_dim)
    assert jnp.all(jnp.isfinite(f_seq_fused)) and jnp.all(jnp.isfinite(e_seq_fused))
    # fused grid-carried recurrence must match the chained per-chunk calls
    assert jnp.allclose(f_seq_chunked, f_seq_fused, atol=1e-5, rtol=1e-5)
    assert jnp.allclose(hidden[0], hidden_fused[0], atol=1e-5, rtol=1e-5)
    assert jnp.allclose(hidden[1], hidden_fused[1], atol=1e-5, rtol=1e-5)
    print("KERNEL_OK")
</pallas_src>

<mosaic_0001>
module attributes {stable_mosaic.version = 11 : i64} {
  func.func @_netE_kernel(%arg0: i32, %arg1: memref<2x8x256xf32, #tpu.memory_space<vmem>>, %arg2: memref<2x2x32xf32, #tpu.memory_space<vmem>>, %arg3: memref<256x64xbf16, #tpu.memory_space<vmem>>, %arg4: memref<64x128xbf16, #tpu.memory_space<vmem>>, %arg5: memref<32x128xbf16, #tpu.memory_space<vmem>>, %arg6: memref<32x128xbf16, #tpu.memory_space<vmem>>, %arg7: memref<1x320xf32, #tpu.memory_space<vmem>>, %arg8: memref<2x8x128xf32, #tpu.memory_space<vmem>>, %arg9: memref<2x8x64xf32, #tpu.memory_space<vmem>>, %arg10: memref<2x2x32xf32, #tpu.memory_space<vmem>>, %arg11: memref<2x8x128xf32, #tpu.memory_space<vmem>>, %arg12: memref<2x8x32xf32, #tpu.memory_space<vmem>>, %arg13: memref<2x2x32xf32, #tpu.memory_space<vmem>>) attributes {dimension_semantics = [#tpu.dimension_semantics<arbitrary>], iteration_bounds = array<i64: 1>, scalar_prefetch = 0 : i64, scratch_operands = 3 : i64, tpu.core_type = #tpu.core_type<tc>, window_params = [{transform_indices = @transform_0, window_bounds = array<i64: 2, 8, 256>}, {pipeline_mode = #tpu.pipeline_mode<synchronous>, transform_indices = @transform_1, window_bounds = array<i64: 2, 2, 32>}, {pipeline_mode = #tpu.pipeline_mode<synchronous>, transform_indices = @transform_2, window_bounds = array<i64: 256, 64>}, {pipeline_mode = #tpu.pipeline_mode<synchronous>, transform_indices = @transform_3, window_bounds = array<i64: 64, 128>}, {pipeline_mode = #tpu.pipeline_mode<synchronous>, transform_indices = @transform_4, window_bounds = array<i64: 32, 128>}, {pipeline_mode = #tpu.pipeline_mode<synchronous>, transform_indices = @transform_5, window_bounds = array<i64: 32, 128>}, {pipeline_mode = #tpu.pipeline_mode<synchronous>, transform_indices = @transform_6, window_bounds = array<i64: 1, 320>}, {transform_indices = @transform_7, window_bounds = array<i64: 2, 8, 128>}, {transform_indices = @transform_8, window_bounds = array<i64: 2, 8, 64>}, {pipeline_mode = #tpu.pipeline_mode<synchronous>, transform_indices = @transform_9, window_bounds = array<i64: 2, 2, 32>}]} {
    %c0_i32 = arith.constant 0 : i32
    %0 = arith.cmpi eq, %arg0, %c0_i32 : i32
    %1 = arith.extui %0 : i1 to i32
    %c0_i32_0 = arith.constant 0 : i32
    %2 = arith.cmpi ne, %1, %c0_i32_0 : i32
    scf.if %2 {
      %c0_101 = arith.constant 0 : index
      %c0_102 = arith.constant 0 : index
      %c0_103 = arith.constant 0 : index
      %231 = vector.load %arg2[%c0_101, %c0_102, %c0_103] : memref<2x2x32xf32, #tpu.memory_space<vmem>>, vector<2x2x32xf32>
      %c0_104 = arith.constant 0 : index
      %c0_105 = arith.constant 0 : index
      %c0_106 = arith.constant 0 : index
      %232 = vector.load %arg13[%c0_104, %c0_105, %c0_106] : memref<2x2x32xf32, #tpu.memory_space<vmem>>, vector<2x2x32xf32>
      tpu.vector_store %arg13[%c0_104, %c0_105, %c0_106], %231 {strides = array<i32>} : memref<2x2x32xf32, #tpu.memory_space<vmem>>, vector<2x2x32xf32>,
    } else {
    }
    %c0 = arith.constant 0 : index
    %c0_1 = arith.constant 0 : index
    %3 = vector.load %arg7[%c0, %c0_1] : memref<1x320xf32, #tpu.memory_space<vmem>>, vector<1x64xf32>
    %c0_2 = arith.constant 0 : index
    %c64 = arith.constant 64 : index
    %4 = vector.load %arg7[%c0_2, %c64] : memref<1x320xf32, #tpu.memory_space<vmem>>, vector<1x128xf32>
    %c0_3 = arith.constant 0 : index
    %c192 = arith.constant 192 : index
    %5 = vector.load %arg7[%c0_3, %c192] : memref<1x320xf32, #tpu.memory_space<vmem>>, vector<1x128xf32>
    %c0_4 = arith.constant 0 : index
    %c0_5 = arith.constant 0 : index
    %c0_6 = arith.constant 0 : index
    %6 = vector.load %arg1[%c0_4, %c0_5, %c0_6] : memref<2x8x256xf32, #tpu.memory_space<vmem>>, vector<2x8x256xf32>
    %7 = vector.shape_cast %6 : vector<2x8x256xf32> to vector<16x256xf32>
    %8 = arith.truncf %7 : vector<16x256xf32> to vector<16x256xbf16>
    %c0_7 = arith.constant 0 : index
    %c0_8 = arith.constant 0 : index
    %9 = vector.load %arg3[%c0_7, %c0_8] : memref<256x64xbf16, #tpu.memory_space<vmem>>, vector<256x64xbf16>
    %cst = arith.constant dense<0.000000e+00> : vector<16x64xf32>
    %10 = tpu.matmul %8, %9, %cst {dimension_numbers = #tpu.dot_dimension_numbers<[1], [0], [0], [1], [0, 0, 1, 1], [], []>} : vector<16x256xbf16>, vector<256x64xbf16>, vector<16x64xf32> -> vector<16x64xf32>
    %11 = vector.broadcast %3 : vector<1x64xf32> to vector<16x64xf32>
    %12 = arith.addf %10, %11 : vector<16x64xf32>
    %cst_9 = arith.constant 0.000000e+00 : f32
    %13 = vector.broadcast %cst_9 : f32 to vector<16x64xf32>
    %14 = arith.maximumf %12, %13 : vector<16x64xf32>
    %15 = vector.shape_cast %14 : vector<16x64xf32> to vector<2x8x64xf32>
    %c0_10 = arith.constant 0 : index
    %c0_11 = arith.constant 0 : index
    %c0_12 = arith.constant 0 : index
    %16 = vector.load %arg9[%c0_10, %c0_11, %c0_12] : memref<2x8x64xf32, #tpu.memory_space<vmem>>, vector<2x8x64xf32>
    tpu.vector_store %arg9[%c0_10, %c0_11, %c0_12], %15 {strides = array<i32>} : memref<2x8x64xf32, #tpu.memory_space<vmem>>, vector<2x8x64xf32>,
    %17 = arith.truncf %14 : vector<16x64xf32> to vector<16x64xbf16>
    %c0_13 = arith.constant 0 : index
    %c0_14 = arith.constant 0 : index
    %18 = vector.load %arg4[%c0_13, %c0_14] : memref<64x128xbf16, #tpu.memory_space<vmem>>, vector<64x128xbf16>
    %cst_15 = arith.constant dense<0.000000e+00> : vector<16x128xf32>
    %19 = tpu.matmul %17, %18, %cst_15 {dimension_numbers = #tpu.dot_dimension_numbers<[1], [0], [0], [1], [0, 0, 1, 1], [], []>} : vector<16x64xbf16>, vector<64x128xbf16>, vector<16x128xf32> -> vector<16x128xf32>
    %20 = vector.broadcast %4 : vector<1x128xf32> to vector<16x128xf32>
    %21 = arith.addf %19, %20 : vector<16x128xf32>
    %22 = vector.shape_cast %21 : vector<16x128xf32> to vector<2x8x128xf32>
    %c0_16 = arith.constant 0 : index
    %c0_17 = arith.constant 0 : index
    %c0_18 = arith.constant 0 : index
    %23 = vector.load %arg11[%c0_16, %c0_17, %c0_18] : memref<2x8x128xf32, #tpu.memory_space<vmem>>, vector<2x8x128xf32>
    tpu.vector_store %arg11[%c0_16, %c0_17, %c0_18], %22 {strides = array<i32>} : memref<2x8x128xf32, #tpu.memory_space<vmem>>, vector<2x8x128xf32>,
    %c0_19 = arith.constant 0 : index
    %c0_20 = arith.constant 0 : index
    %24 = vector.load %arg5[%c0_19, %c0_20] : memref<32x128xbf16, #tpu.memory_space<vmem>>, vector<32x128xbf16>
    %c0_21 = arith.constant 0 : index
    %c0_22 = arith.constant 0 : index
    %c0_23 = arith.constant 0 : index
    %25 = vector.load %arg13[%c0_21, %c0_22, %c0_23] : memref<2x2x32xf32, #tpu.memory_space<vmem>>, vector<1x2x32xf32>
    %26 = vector.shape_cast %25 : vector<1x2x32xf32> to vector<2x32xf32>
    %c1 = arith.constant 1 : index
    %c0_24 = arith.constant 0 : index
    %c0_25 = arith.constant 0 : index
    %27 = vector.load %arg13[%c1, %c0_24, %c0_25] : memref<2x2x32xf32, #tpu.memory_space<vmem>>, vector<1x2x32xf32>
    %28 = vector.shape_cast %27 : vector<1x2x32xf32> to vector<2x32xf32>
    %c0_26 = arith.constant 0 : index
    %c0_27 = arith.constant 0 : index
    %c0_28 = arith.constant 0 : index
    %29 = vector.load %arg11[%c0_26, %c0_27, %c0_28] : memref<2x8x128xf32, #tpu.memory_space<vmem>>, vector<2x1x128xf32>
    %30 = vector.shape_cast %29 : vector<2x1x128xf32> to vector<2x128xf32>
    %31 = arith.truncf %26 : vector<2x32xf32> to vector<2x32xbf16>
    %cst_29 = arith.constant dense<0.000000e+00> : vector<2x128xf32>
    %32 = tpu.matmul %31, %24, %cst_29 {dimension_numbers = #tpu.dot_dimension_numbers<[1], [0], [0], [1], [0, 0, 1, 1], [], []>} : vector<2x32xbf16>, vector<32x128xbf16>, vector<2x128xf32> -> vector<2x128xf32>
    %33 = arith.addf %30, %32 : vector<2x128xf32>
    %34 = arith.negf %33 : vector<2x128xf32>
    %35 = math.exp %34 : vector<2x128xf32>
    %cst_30 = arith.constant 1.000000e+00 : f32
    %36 = vector.broadcast %cst_30 : f32 to vector<2x128xf32>
    %37 = arith.addf %36, %35 : vector<2x128xf32>
    %38 = arith.divf %36, %37 : vector<2x128xf32>
    %39 = math.tanh %33 : vector<2x128xf32>
    %40 = vector.extract_strided_slice %38 {offsets = [0, 0], sizes = [2, 32], strides = [1, 1]} : vector<2x128xf32> to vector<2x32xf32>
    %41 = vector.extract_strided_slice %38 {offsets = [0, 32], sizes = [2, 32], strides = [1, 1]} : vector<2x128xf32> to vector<2x32xf32>
    %42 = vector.extract_strided_slice %39 {offsets = [0, 64], sizes = [2, 32], strides = [1, 1]} : vector<2x128xf32> to vector<2x32xf32>
    %43 = vector.extract_strided_slice %38 {offsets = [0, 96], sizes = [2, 32], strides = [1, 1]} : vector<2x128xf32> to vector<2x32xf32>
    %44 = arith.mulf %41, %28 : vector<2x32xf32>
    %45 = arith.mulf %40, %42 : vector<2x32xf32>
    %46 = arith.addf %44, %45 : vector<2x32xf32>
    %47 = math.tanh %46 : vector<2x32xf32>
    %48 = arith.mulf %43, %47 : vector<2x32xf32>
    %c0_31 = arith.constant 0 : index
    %c0_32 = arith.constant 0 : index
    %c0_33 = arith.constant 0 : index
    %49 = vector.load %arg12[%c0_31, %c0_32, %c0_33] : memref<2x8x32xf32, #tpu.memory_space<vmem>>, vector<2x1x32xf32>
    %50 = vector.shape_cast %49 : vector<2x1x32xf32> to vector<2x32xf32>
    %51 = vector.shape_cast %48 : vector<2x32xf32> to vector<2x1x32xf32>
    tpu.vector_store %arg12[%c0_31, %c0_32, %c0_33], %51 {strides = array<i32>} : memref<2x8x32xf32, #tpu.memory_space<vmem>>, vector<2x1x32xf32>,
    %c0_34 = arith.constant 0 : index
    %c1_35 = arith.constant 1 : index
    %c0_36 = arith.constant 0 : index
    %52 = vector.load %arg11[%c0_34, %c1_35, %c0_36] : memref<2x8x128xf32, #tpu.memory_space<vmem>>, vector<2x1x128xf32>
    %53 = vector.shape_cast %52 : vector<2x1x128xf32> to vector<2x128xf32>
    %54 = arith.truncf %48 : vector<2x32xf32> to vector<2x32xbf16>
    %cst_37 = arith.constant dense<0.000000e+00> : vector<2x128xf32>
    %55 = tpu.matmul %54, %24, %cst_37 {dimension_numbers = #tpu.dot_dimension_numbers<[1], [0], [0], [1], [0, 0, 1, 1], [], []>} : vector<2x32xbf16>, vector<32x128xbf16>, vector<2x128xf32> -> vector<2x128xf32>
    %56 = arith.addf %53, %55 : vector<2x128xf32>
    %57 = arith.negf %56 : vector<2x128xf32>
    %58 = math.exp %57 : vector<2x128xf32>
    %cst_38 = arith.constant 1.000000e+00 : f32
    %59 = vector.broadcast %cst_38 : f32 to vector<2x128xf32>
    %60 = arith.addf %59, %58 : vector<2x128xf32>
    %61 = arith.divf %59, %60 : vector<2x128xf32>
    %62 = math.tanh %56 : vector<2x128xf32>
    %63 = vector.extract_strided_slice %61 {offsets = [0, 0], sizes = [2, 32], strides = [1, 1]} : vector<2x128xf32> to vector<2x32xf32>
    %64 = vector.extract_strided_slice %61 {offsets = [0, 32], sizes = [2, 32], strides = [1, 1]} : vector<2x128xf32> to vector<2x32xf32>
    %65 = vector.extract_strided_slice %62 {offsets = [0, 64], sizes = [2, 32], strides = [1, 1]} : vector<2x128xf32> to vector<2x32xf32>
    %66 = vector.extract_strided_slice %61 {offsets = [0, 96], sizes = [2, 32], strides = [1, 1]} : vector<2x128xf32> to vector<2x32xf32>
    %67 = arith.mulf %64, %46 : vector<2x32xf32>
    %68 = arith.mulf %63, %65 : vector<2x32xf32>
    %69 = arith.addf %67, %68 : vector<2x32xf32>
    %70 = math.tanh %69 : vector<2x32xf32>
    %71 = arith.mulf %66, %70 : vector<2x32xf32>
    %c0_39 = arith.constant 0 : index
    %c1_40 = arith.constant 1 : index
    %c0_41 = arith.constant 0 : index
    %72 = vector.load %arg12[%c0_39, %c1_40, %c0_41] : memref<2x8x32xf32, #tpu.memory_space<vmem>>, vector<2x1x32xf32>
    %73 = vector.shape_cast %72 : vector<2x1x32xf32> to vector<2x32xf32>
    %74 = vector.shape_cast %71 : vector<2x32xf32> to vector<2x1x32xf32>
    tpu.vector_store %arg12[%c0_39, %c1_40, %c0_41], %74 {strides = array<i32>} : memref<2x8x32xf32, #tpu.memory_space<vmem>>, vector<2x1x32xf32>,
    %c0_42 = arith.constant 0 : index
    %c2 = arith.constant 2 : index
    %c0_43 = arith.constant 0 : index
    %75 = vector.load %arg11[%c0_42, %c2, %c0_43] : memref<2x8x128xf32, #tpu.memory_space<vmem>>, vector<2x1x128xf32>
    %76 = vector.shape_cast %75 : vector<2x1x128xf32> to vector<2x128xf32>
    %77 = arith.truncf %71 : vector<2x32xf32> to vector<2x32xbf16>
    %cst_44 = arith.constant dense<0.000000e+00> : vector<2x128xf32>
    %78 = tpu.matmul %77, %24, %cst_44 {dimension_numbers = #tpu.dot_dimension_numbers<[1], [0], [0], [1], [0, 0, 1, 1], [], []>} : vector<2x32xbf16>, vector<32x128xbf16>, vector<2x128xf32> -> vector<2x128xf32>
    %79 = arith.addf %76, %78 : vector<2x128xf32>
    %80 = arith.negf %79 : vector<2x128xf32>
    %81 = math.exp %80 : vector<2x128xf32>
    %cst_45 = arith.constant 1.000000e+00 : f32
    %82 = vector.broadcast %cst_45 : f32 to vector<2x128xf32>
    %83 = arith.addf %82, %81 : vector<2x128xf32>
    %84 = arith.divf %82, %83 : vector<2x128xf32>
    %85 = math.tanh %79 : vector<2x128xf32>
    %86 = vector.extract_strided_slice %84 {offsets = [0, 0], sizes = [2, 32], strides = [1, 1]} : vector<2x128xf32> to vector<2x32xf32>
    %87 = vector.extract_strided_slice %84 {offsets = [0, 32], sizes = [2, 32], strides = [1, 1]} : vector<2x128xf32> to vector<2x32xf32>
    %88 = vector.extract_strided_slice %85 {offsets = [0, 64], sizes = [2, 32], strides = [1, 1]} : vector<2x128xf32> to vector<2x32xf32>
    %89 = vector.extract_strided_slice %84 {offsets = [0, 96], sizes = [2, 32], strides = [1, 1]} : vector<2x128xf32> to vector<2x32xf32>
    %90 = arith.mulf %87, %69 : vector<2x32xf32>
    %91 = arith.mulf %86, %88 : vector<2x32xf32>
    %92 = arith.addf %90, %91 : vector<2x32xf32>
    %93 = math.tanh %92 : vector<2x32xf32>
    %94 = arith.mulf %89, %93 : vector<2x32xf32>
    %c0_46 = arith.constant 0 : index
    %c2_47 = arith.constant 2 : index
    %c0_48 = arith.constant 0 : index
    %95 = vector.load %arg12[%c0_46, %c2_47, %c0_48] : memref<2x8x32xf32, #tpu.memory_space<vmem>>, vector<2x1x32xf32>
    %96 = vector.shape_cast %95 : vector<2x1x32xf32> to vector<2x32xf32>
    %97 = vector.shape_cast %94 : vector<2x32xf32> to vector<2x1x32xf32>
    tpu.vector_store %arg12[%c0_46, %c2_47, %c0_48], %97 {strides = array<i32>} : memref<2x8x32xf32, #tpu.memory_space<vmem>>, vector<2x1x32xf32>,
    %c0_49 = arith.constant 0 : index
    %c3 = arith.constant 3 : index
    %c0_50 = arith.constant 0 : index
    %98 = vector.load %arg11[%c0_49, %c3, %c0_50] : memref<2x8x128xf32, #tpu.memory_space<vmem>>, vector<2x1x128xf32>
    %99 = vector.shape_cast %98 : vector<2x1x128xf32> to vector<2x128xf32>
    %100 = arith.truncf %94 : vector<2x32xf32> to vector<2x32xbf16>
    %cst_51 = arith.constant dense<0.000000e+00> : vector<2x128xf32>
    %101 = tpu.matmul %100, %24, %cst_51 {dimension_numbers = #tpu.dot_dimension_numbers<[1], [0], [0], [1], [0, 0, 1, 1], [], []>} : vector<2x32xbf16>, vector<32x128xbf16>, vector<2x128xf32> -> vector<2x128xf32>
    %102 = arith.addf %99, %101 : vector<2x128xf32>
    %103 = arith.negf %102 : vector<2x128xf32>
    %104 = math.exp %103 : vector<2x128xf32>
    %cst_52 = arith.constant 1.000000e+00 : f32
    %105 = vector.broadcast %cst_52 : f32 to vector<2x128xf32>
    %106 = arith.addf %105, %104 : vector<2x128xf32>
    %107 = arith.divf %105, %106 : vector<2x128xf32>
    %108 = math.tanh %102 : vector<2x128xf32>
    %109 = vector.extract_strided_slice %107 {offsets = [0, 0], sizes = [2, 32], strides = [1, 1]} : vector<2x128xf32> to vector<2x32xf32>
    %110 = vector.extract_strided_slice %107 {offsets = [0, 32], sizes = [2, 32], strides = [1, 1]} : vector<2x128xf32> to vector<2x32xf32>
    %111 = vector.extract_strided_slice %108 {offsets = [0, 64], sizes = [2, 32], strides = [1, 1]} : vector<2x128xf32> to vector<2x32xf32>
    %112 = vector.extract_strided_slice %107 {offsets = [0, 96], sizes = [2, 32], strides = [1, 1]} : vector<2x128xf32> to vector<2x32xf32>
    %113 = arith.mulf %110, %92 : vector<2x32xf32>
    %114 = arith.mulf %109, %111 : vector<2x32xf32>
    %115 = arith.addf %113, %114 : vector<2x32xf32>
    %116 = math.tanh %115 : vector<2x32xf32>
    %117 = arith.mulf %112, %116 : vector<2x32xf32>
    %c0_53 = arith.constant 0 : index
    %c3_54 = arith.constant 3 : index
    %c0_55 = arith.constant 0 : index
    %118 = vector.load %arg12[%c0_53, %c3_54, %c0_55] : memref<2x8x32xf32, #tpu.memory_space<vmem>>, vector<2x1x32xf32>
    %119 = vector.shape_cast %118 : vector<2x1x32xf32> to vector<2x32xf32>
    %120 = vector.shape_cast %117 : vector<2x32xf32> to vector<2x1x32xf32>
    tpu.vector_store %arg12[%c0_53, %c3_54, %c0_55], %120 {strides = array<i32>} : memref<2x8x32xf32, #tpu.memory_space<vmem>>, vector<2x1x32xf32>,
    %c0_56 = arith.constant 0 : index
    %c4 = arith.constant 4 : index
    %c0_57 = arith.constant 0 : index
    %121 = vector.load %arg11[%c0_56, %c4, %c0_57] : memref<2x8x128xf32, #tpu.memory_space<vmem>>, vector<2x1x128xf32>
    %122 = vector.shape_cast %121 : vector<2x1x128xf32> to vector<2x128xf32>
    %123 = arith.truncf %117 : vector<2x32xf32> to vector<2x32xbf16>
    %cst_58 = arith.constant dense<0.000000e+00> : vector<2x128xf32>
    %124 = tpu.matmul %123, %24, %cst_58 {dimension_numbers = #tpu.dot_dimension_numbers<[1], [0], [0], [1], [0, 0, 1, 1], [], []>} : vector<2x32xbf16>, vector<32x128xbf16>, vector<2x128xf32> -> vector<2x128xf32>
    %125 = arith.addf %122, %124 : vector<2x128xf32>
    %126 = arith.negf %125 : vector<2x128xf32>
    %127 = math.exp %126 : vector<2x128xf32>
    %cst_59 = arith.constant 1.000000e+00 : f32
    %128 = vector.broadcast %cst_59 : f32 to vector<2x128xf32>
    %129 = arith.addf %128, %127 : vector<2x128xf32>
    %130 = arith.divf %128, %129 : vector<2x128xf32>
    %131 = math.tanh %125 : vector<2x128xf32>
    %132 = vector.extract_strided_slice %130 {offsets = [0, 0], sizes = [2, 32], strides = [1, 1]} : vector<2x128xf32> to vector<2x32xf32>
    %133 = vector.extract_strided_slice %130 {offsets = [0, 32], sizes = [2, 32], strides = [1, 1]} : vector<2x128xf32> to vector<2x32xf32>
    %134 = vector.extract_strided_slice %131 {offsets = [0, 64], sizes = [2, 32], strides = [1, 1]} : vector<2x128xf32> to vector<2x32xf32>
    %135 = vector.extract_strided_slice %130 {offsets = [0, 96], sizes = [2, 32], strides = [1, 1]} : vector<2x128xf32> to vector<2x32xf32>
    %136 = arith.mulf %133, %115 : vector<2x32xf32>
    %137 = arith.mulf %132, %134 : vector<2x32xf32>
    %138 = arith.addf %136, %137 : vector<2x32xf32>
    %139 = math.tanh %138 : vector<2x32xf32>
    %140 = arith.mulf %135, %139 : vector<2x32xf32>
    %c0_60 = arith.constant 0 : index
    %c4_61 = arith.constant 4 : index
    %c0_62 = arith.constant 0 : index
    %141 = vector.load %arg12[%c0_60, %c4_61, %c0_62] : memref<2x8x32xf32, #tpu.memory_space<vmem>>, vector<2x1x32xf32>
    %142 = vector.shape_cast %141 : vector<2x1x32xf32> to vector<2x32xf32>
    %143 = vector.shape_cast %140 : vector<2x32xf32> to vector<2x1x32xf32>
    tpu.vector_store %arg12[%c0_60, %c4_61, %c0_62], %143 {strides = array<i32>} : memref<2x8x32xf32, #tpu.memory_space<vmem>>, vector<2x1x32xf32>,
    %c0_63 = arith.constant 0 : index
    %c5 = arith.constant 5 : index
    %c0_64 = arith.constant 0 : index
    %144 = vector.load %arg11[%c0_63, %c5, %c0_64] : memref<2x8x128xf32, #tpu.memory_space<vmem>>, vector<2x1x128xf32>
    %145 = vector.shape_cast %144 : vector<2x1x128xf32> to vector<2x128xf32>
    %146 = arith.truncf %140 : vector<2x32xf32> to vector<2x32xbf16>
    %cst_65 = arith.constant dense<0.000000e+00> : vector<2x128xf32>
    %147 = tpu.matmul %146, %24, %cst_65 {dimension_numbers = #tpu.dot_dimension_numbers<[1], [0], [0], [1], [0, 0, 1, 1], [], []>} : vector<2x32xbf16>, vector<32x128xbf16>, vector<2x128xf32> -> vector<2x128xf32>
    %148 = arith.addf %145, %147 : vector<2x128xf32>
    %149 = arith.negf %148 : vector<2x128xf32>
    %150 = math.exp %149 : vector<2x128xf32>
    %cst_66 = arith.constant 1.000000e+00 : f32
    %151 = vector.broadcast %cst_66 : f32 to vector<2x128xf32>
    %152 = arith.addf %151, %150 : vector<2x128xf32>
    %153 = arith.divf %151, %152 : vector<2x128xf32>
    %154 = math.tanh %148 : vector<2x128xf32>
    %155 = vector.extract_strided_slice %153 {offsets = [0, 0], sizes = [2, 32], strides = [1, 1]} : vector<2x128xf32> to vector<2x32xf32>
    %156 = vector.extract_strided_slice %153 {offsets = [0, 32], sizes = [2, 32], strides = [1, 1]} : vector<2x128xf32> to vector<2x32xf32>
    %157 = vector.extract_strided_slice %154 {offsets = [0, 64], sizes = [2, 32], strides = [1, 1]} : vector<2x128xf32> to vector<2x32xf32>
    %158 = vector.extract_strided_slice %153 {offsets = [0, 96], sizes = [2, 32], strides = [1, 1]} : vector<2x128xf32> to vector<2x32xf32>
    %159 = arith.mulf %156, %138 : vector<2x32xf32>
    %160 = arith.mulf %155, %157 : vector<2x32xf32>
    %161 = arith.addf %159, %160 : vector<2x32xf32>
    %162 = math.tanh %161 : vector<2x32xf32>
    %163 = arith.mulf %158, %162 : vector<2x32xf32>
    %c0_67 = arith.constant 0 : index
    %c5_68 = arith.constant 5 : index
    %c0_69 = arith.constant 0 : index
    %164 = vector.load %arg12[%c0_67, %c5_68, %c0_69] : memref<2x8x32xf32, #tpu.memory_space<vmem>>, vector<2x1x32xf32>
    %165 = vector.shape_cast %164 : vector<2x1x32xf32> to vector<2x32xf32>
    %166 = vector.shape_cast %163 : vector<2x32xf32> to vector<2x1x32xf32>
    tpu.vector_store %arg12[%c0_67, %c5_68, %c0_69], %166 {strides = array<i32>} : memref<2x8x32xf32, #tpu.memory_space<vmem>>, vector<2x1x32xf32>,
    %c0_70 = arith.constant 0 : index
    %c6 = arith.constant 6 : index
    %c0_71 = arith.constant 0 : index
    %167 = vector.load %arg11[%c0_70, %c6, %c0_71] : memref<2x8x128xf32, #tpu.memory_space<vmem>>, vector<2x1x128xf32>
    %168 = vector.shape_cast %167 : vector<2x1x128xf32> to vector<2x128xf32>
    %169 = arith.truncf %163 : vector<2x32xf32> to vector<2x32xbf16>
    %cst_72 = arith.constant dense<0.000000e+00> : vector<2x128xf32>
    %170 = tpu.matmul %169, %24, %cst_72 {dimension_numbers = #tpu.dot_dimension_numbers<[1], [0], [0], [1], [0, 0, 1, 1], [], []>} : vector<2x32xbf16>, vector<32x128xbf16>, vector<2x128xf32> -> vector<2x128xf32>
    %171 = arith.addf %168, %170 : vector<2x128xf32>
    %172 = arith.negf %171 : vector<2x128xf32>
    %173 = math.exp %172 : vector<2x128xf32>
    %cst_73 = arith.constant 1.000000e+00 : f32
    %174 = vector.broadcast %cst_73 : f32 to vector<2x128xf32>
    %175 = arith.addf %174, %173 : vector<2x128xf32>
    %176 = arith.divf %174, %175 : vector<2x128xf32>
    %177 = math.tanh %171 : vector<2x128xf32>
    %178 = vector.extract_strided_slice %176 {offsets = [0, 0], sizes = [2, 32], strides = [1, 1]} : vector<2x128xf32> to vector<2x32xf32>
    %179 = vector.extract_strided_slice %176 {offsets = [0, 32], sizes = [2, 32], strides = [1, 1]} : vector<2x128xf32> to vector<2x32xf32>
    %180 = vector.extract_strided_slice %177 {offsets = [0, 64], sizes = [2, 32], strides = [1, 1]} : vector<2x128xf32> to vector<2x32xf32>
    %181 = vector.extract_strided_slice %176 {offsets = [0, 96], sizes = [2, 32], strides = [1, 1]} : vector<2x128xf32> to vector<2x32xf32>
    %182 = arith.mulf %179, %161 : vector<2x32xf32>
    %183 = arith.mulf %178, %180 : vector<2x32xf32>
    %184 = arith.addf %182, %183 : vector<2x32xf32>
    %185 = math.tanh %184 : vector<2x32xf32>
    %186 = arith.mulf %181, %185 : vector<2x32xf32>
    %c0_74 = arith.constant 0 : index
    %c6_75 = arith.constant 6 : index
    %c0_76 = arith.constant 0 : index
    %187 = vector.load %arg12[%c0_74, %c6_75, %c0_76] : memref<2x8x32xf32, #tpu.memory_space<vmem>>, vector<2x1x32xf32>
    %188 = vector.shape_cast %187 : vector<2x1x32xf32> to vector<2x32xf32>
    %189 = vector.shape_cast %186 : vector<2x32xf32> to vector<2x1x32xf32>
    tpu.vector_store %arg12[%c0_74, %c6_75, %c0_76], %189 {strides = array<i32>} : memref<2x8x32xf32, #tpu.memory_space<vmem>>, vector<2x1x32xf32>,
    %c0_77 = arith.constant 0 : index
    %c7 = arith.constant 7 : index
    %c0_78 = arith.constant 0 : index
    %190 = vector.load %arg11[%c0_77, %c7, %c0_78] : memref<2x8x128xf32, #tpu.memory_space<vmem>>, vector<2x1x128xf32>
    %191 = vector.shape_cast %190 : vector<2x1x128xf32> to vector<2x128xf32>
    %192 = arith.truncf %186 : vector<2x32xf32> to vector<2x32xbf16>
    %cst_79 = arith.constant dense<0.000000e+00> : vector<2x128xf32>
    %193 = tpu.matmul %192, %24, %cst_79 {dimension_numbers = #tpu.dot_dimension_numbers<[1], [0], [0], [1], [0, 0, 1, 1], [], []>} : vector<2x32xbf16>, vector<32x128xbf16>, vector<2x128xf32> -> vector<2x128xf32>
    %194 = arith.addf %191, %193 : vector<2x128xf32>
    %195 = arith.negf %194 : vector<2x128xf32>
    %196 = math.exp %195 : vector<2x128xf32>
    %cst_80 = arith.constant 1.000000e+00 : f32
    %197 = vector.broadcast %cst_80 : f32 to vector<2x128xf32>
    %198 = arith.addf %197, %196 : vector<2x128xf32>
    %199 = arith.divf %197, %198 : vector<2x128xf32>
    %200 = math.tanh %194 : vector<2x128xf32>
    %201 = vector.extract_strided_slice %199 {offsets = [0, 0], sizes = [2, 32], strides = [1, 1]} : vector<2x128xf32> to vector<2x32xf32>
    %202 = vector.extract_strided_slice %199 {offsets = [0, 32], sizes = [2, 32], strides = [1, 1]} : vector<2x128xf32> to vector<2x32xf32>
    %203 = vector.extract_strided_slice %200 {offsets = [0, 64], sizes = [2, 32], strides = [1, 1]} : vector<2x128xf32> to vector<2x32xf32>
    %204 = vector.extract_strided_slice %199 {offsets = [0, 96], sizes = [2, 32], strides = [1, 1]} : vector<2x128xf32> to vector<2x32xf32>
    %205 = arith.mulf %202, %184 : vector<2x32xf32>
    %206 = arith.mulf %201, %203 : vector<2x32xf32>
    %207 = arith.addf %205, %206 : vector<2x32xf32>
    %208 = math.tanh %207 : vector<2x32xf32>
    %209 = arith.mulf %204, %208 : vector<2x32xf32>
    %c0_81 = arith.constant 0 : index
    %c7_82 = arith.constant 7 : index
    %c0_83 = arith.constant 0 : index
    %210 = vector.load %arg12[%c0_81, %c7_82, %c0_83] : memref<2x8x32xf32, #tpu.memory_space<vmem>>, vector<2x1x32xf32>
    %211 = vector.shape_cast %210 : vector<2x1x32xf32> to vector<2x32xf32>
    %212 = vector.shape_cast %209 : vector<2x32xf32> to vector<2x1x32xf32>
    tpu.vector_store %arg12[%c0_81, %c7_82, %c0_83], %212 {strides = array<i32>} : memref<2x8x32xf32, #tpu.memory_space<vmem>>, vector<2x1x32xf32>,
    %c0_84 = arith.constant 0 : index
    %c0_85 = arith.constant 0 : index
    %c0_86 = arith.constant 0 : index
    %213 = vector.load %arg13[%c0_84, %c0_85, %c0_86] : memref<2x2x32xf32, #tpu.memory_space<vmem>>, vector<1x2x32xf32>
    %214 = vector.shape_cast %213 : vector<1x2x32xf32> to vector<2x32xf32>
    %215 = vector.shape_cast %209 : vector<2x32xf32> to vector<1x2x32xf32>
    tpu.vector_store %arg13[%c0_84, %c0_85, %c0_86], %215 {strides = array<i32>} : memref<2x2x32xf32, #tpu.memory_space<vmem>>, vector<1x2x32xf32>,
    %c1_87 = arith.constant 1 : index
    %c0_88 = arith.constant 0 : index
    %c0_89 = arith.constant 0 : index
    %216 = vector.load %arg13[%c1_87, %c0_88, %c0_89] : memref<2x2x32xf32, #tpu.memory_space<vmem>>, vector<1x2x32xf32>
    %217 = vector.shape_cast %216 : vector<1x2x32xf32> to vector<2x32xf32>
    %218 = vector.shape_cast %207 : vector<2x32xf32> to vector<1x2x32xf32>
    tpu.vector_store %arg13[%c1_87, %c0_88, %c0_89], %218 {strides = array<i32>} : memref<2x2x32xf32, #tpu.memory_space<vmem>>, vector<1x2x32xf32>,
    %c0_i32_90 = arith.constant 0 : i32
    %219 = arith.cmpi eq, %arg0, %c0_i32_90 : i32
    %220 = arith.extui %219 : i1 to i32
    %c0_i32_91 = arith.constant 0 : i32
    %221 = arith.cmpi ne, %220, %c0_i32_91 : i32
    scf.if %221 {
      %c0_101 = arith.constant 0 : index
      %c0_102 = arith.constant 0 : index
      %c0_103 = arith.constant 0 : index
      %231 = vector.load %arg13[%c0_101, %c0_102, %c0_103] : memref<2x2x32xf32, #tpu.memory_space<vmem>>, vector<2x2x32xf32>
      %c0_104 = arith.constant 0 : index
      %c0_105 = arith.constant 0 : index
      %c0_106 = arith.constant 0 : index
      %232 = vector.load %arg10[%c0_104, %c0_105, %c0_106] : memref<2x2x32xf32, #tpu.memory_space<vmem>>, vector<2x2x32xf32>
      tpu.vector_store %arg10[%c0_104, %c0_105, %c0_106], %231 {strides = array<i32>} : memref<2x2x32xf32, #tpu.memory_space<vmem>>, vector<2x2x32xf32>,
    } else {
    }
    %c0_92 = arith.constant 0 : index
    %c0_93 = arith.constant 0 : index
    %c0_94 = arith.constant 0 : index
    %222 = vector.load %arg12[%c0_92, %c0_93, %c0_94] : memref<2x8x32xf32, #tpu.memory_space<vmem>>, vector<2x8x32xf32>
    %223 = vector.shape_cast %222 : vector<2x8x32xf32> to vector<16x32xf32>
    %224 = arith.truncf %223 : vector<16x32xf32> to vector<16x32xbf16>
    %c0_95 = arith.constant 0 : index
    %c0_96 = arith.constant 0 : index
    %225 = vector.load %arg6[%c0_95, %c0_96] : memref<32x128xbf16, #tpu.memory_space<vmem>>, vector<32x128xbf16>
    %cst_97 = arith.constant dense<0.000000e+00> : vector<16x128xf32>
    %226 = tpu.matmul %224, %225, %cst_97 {dimension_numbers = #tpu.dot_dimension_numbers<[1], [0], [0], [1], [0, 0, 1, 1], [], []>} : vector<16x32xbf16>, vector<32x128xbf16>, vector<16x128xf32> -> vector<16x128xf32>
    %227 = vector.broadcast %5 : vector<1x128xf32> to vector<16x128xf32>
    %228 = arith.addf %226, %227 : vector<16x128xf32>
    %229 = vector.shape_cast %228 : vector<16x128xf32> to vector<2x8x128xf32>
    %c0_98 = arith.constant 0 : index
    %c0_99 = arith.constant 0 : index
    %c0_100 = arith.constant 0 : index
    %230 = vector.load %arg8[%c0_98, %c0_99, %c0_100] : memref<2x8x128xf32, #tpu.memory_space<vmem>>, vector<2x8x128xf32>
    tpu.vector_store %arg8[%c0_98, %c0_99, %c0_100], %229 {strides = array<i32>} : memref<2x8x128xf32, #tpu.memory_space<vmem>>, vector<2x8x128xf32>,
    return
  }
  func.func @transform_0(%arg0: i32) -> (i32, i32, i32) {
    %c0_i32 = arith.constant 0 : i32
    %c0_i32_0 = arith.constant 0 : i32
    %c0_i32_1 = arith.constant 0 : i32
    return %c0_i32, %arg0, %c0_i32_0 : i32, i32, i32
  }
  func.func @transform_1(%arg0: i32) -> (i32, i32, i32) {
    %c0_i32 = arith.constant 0 : i32
    %c0_i32_0 = arith.constant 0 : i32
    %c0_i32_1 = arith.constant 0 : i32
    %c0_i32_2 = arith.constant 0 : i32
    return %c0_i32, %c0_i32_0, %c0_i32_1 : i32, i32, i32
  }
  func.func @transform_2(%arg0: i32) -> (i32, i32) {
    %c0_i32 = arith.constant 0 : i32
    %c0_i32_0 = arith.constant 0 : i32
    %c0_i32_1 = arith.constant 0 : i32
    return %c0_i32, %c0_i32_0 : i32, i32
  }
  func.func @transform_3(%arg0: i32) -> (i32, i32) {
    %c0_i32 = arith.constant 0 : i32
    %c0_i32_0 = arith.constant 0 : i32
    %c0_i32_1 = arith.constant 0 : i32
    return %c0_i32, %c0_i32_0 : i32, i32
  }
  func.func @transform_4(%arg0: i32) -> (i32, i32) {
    %c0_i32 = arith.constant 0 : i32
    %c0_i32_0 = arith.constant 0 : i32
    %c0_i32_1 = arith.constant 0 : i32
    return %c0_i32, %c0_i32_0 : i32, i32
  }
  func.func @transform_5(%arg0: i32) -> (i32, i32) {
    %c0_i32 = arith.constant 0 : i32
    %c0_i32_0 = arith.constant 0 : i32
    %c0_i32_1 = arith.constant 0 : i32
    return %c0_i32, %c0_i32_0 : i32, i32
  }
  func.func @transform_6(%arg0: i32) -> (i32, i32) {
    %c0_i32 = arith.constant 0 : i32
    %c0_i32_0 = arith.constant 0 : i32
    %c0_i32_1 = arith.constant 0 : i32
    return %c0_i32, %c0_i32_0 : i32, i32
  }
  func.func @transform_7(%arg0: i32) -> (i32, i32, i32) {
    %c0_i32 = arith.constant 0 : i32
    %c0_i32_0 = arith.constant 0 : i32
    %c0_i32_1 = arith.constant 0 : i32
    return %c0_i32, %arg0, %c0_i32_0 : i32, i32, i32
  }
  func.func @transform_8(%arg0: i32) -> (i32, i32, i32) {
    %c0_i32 = arith.constant 0 : i32
    %c0_i32_0 = arith.constant 0 : i32
    %c0_i32_1 = arith.constant 0 : i32
    return %c0_i32, %arg0, %c0_i32_0 : i32, i32, i32
  }
  func.func @transform_9(%arg0: i32) -> (i32, i32, i32) {
    %c0_i32 = arith.constant 0 : i32
    %c0_i32_0 = arith.constant 0 : i32
    %c0_i32_1 = arith.constant 0 : i32
    %c0_i32_2 = arith.constant 0 : i32
    return %c0_i32, %c0_i32_0, %c0_i32_1 : i32, i32, i32
  }
}

</mosaic_0001>

<bundles_post_ra>
// kernel: _netE_call.1
= control target key start
LH: loop header
LB: loop body
LE: loop exit
PB: predicated region body
PF: predicated region fallthrough
CT: control target
= control target key end

     0   :  { %15 = vsyncpa [#allocation6], 0  ;;  %v1875_v2 = vmov 0.0   ;;  %s2350_s0 = inlined_call_operand.vmem [shape: f32[2,8,256], index: 0, kind: input, shape index: {}]   ;;  %s2351_s1 = inlined_call_operand.vmem [shape: f32[2,2,32], index: 1, kind: input, shape index: {}]   ;;  %s2352_s2 = inlined_call_operand.vmem [shape: bf16[256,64], index: 2, kind: input, shape index: {}]   ;;  %s2353_s3 = inlined_call_operand.vmem [shape: bf16[64,128], index: 3, kind: input, shape index: {}]   ;;  %s2354_s4 = inlined_call_operand.vmem [shape: bf16[32,128], index: 4, kind: input, shape index: {}]   ;;  %s2355_s5 = inlined_call_operand.vmem [shape: bf16[32,128], index: 5, kind: input, shape index: {}]   ;;  %s2356_s6 = inlined_call_operand.vmem [shape: f32[1,320], index: 6, kind: input, shape index: {}]   ;;  %s2357_s7 = inlined_call_operand.hbm [shape: f32[2,8,128], index: 7, kind: output, shape index: {0}]   ;;  %s2358_s8 = inlined_call_operand.hbm [shape: f32[2,8,64], index: 8, kind: output, shape index: {1}]   ;;  %s2359_s9 = inlined_call_operand.hbm [shape: f32[2,2,32], index: 9, kind: output, shape index: {2}]  }
   0x1   :  { %v1653_v0 = vld [vmem:[%s2352_s2 + $0x40] sm:$0xff]   ;;  %1558 = vmatprep.subr.bf16.mxu1 %v1875_v2  ;;  %v1655_v3 = vld [vmem:[%s2352_s2 + $0x48] sm:$0xff]   ;;  %v1657_v5 = vld [vmem:[%s2352_s2 + $0x50] sm:$0xff]  }
   0x2   :  { %v1654_v1 = vld [vmem:[%s2352_s2] sm:$0xff]   ;;  %1504 = vmatprep.subr.bf16.mxu0 %v1653_v0  ;;  %v1656_v4 = vld [vmem:[%s2352_s2 + $0x8] sm:$0xff]   ;;  %v1658_v6 = vld [vmem:[%s2352_s2 + $0x10] sm:$0xff]  }
   0x3   :  { %1505 = vmatpush3.bf16.msra.mxu0 %v1654_v1  ;;  %v1659_v7 = vld [vmem:[%s2352_s2 + $0x58] sm:$0xff]   ;;  %v1661_v9 = vld [vmem:[%s2352_s2 + $0x60] sm:$0xff]   ;;  %v1663_v11 = vld [vmem:[%s2352_s2 + $0x68] sm:$0xff]  }
   0x4   :  { %1506 = vmatprep.subr.bf16.mxu0 %v1655_v3  ;;  %v1660_v8 = vld [vmem:[%s2352_s2 + $0x18] sm:$0xff]   ;;  %v1662_v10 = vld [vmem:[%s2352_s2 + $0x20] sm:$0xff]   ;;  %v45_v12 = vld [vmem:[%s2350_s0 + $0x8] sm:$0xff] }
   0x5   :  { %v47_v13 = vld [vmem:[%s2350_s0 + $0x18] sm:$0xff]  ;;  %v1664_v14 = vld [vmem:[%s2352_s2 + $0x28] sm:$0xff]   ;;  %v1665_v16 = vld [vmem:[%s2352_s2 + $0x70] sm:$0xff]  }
   0x6   :  { %v49_v15 = vpack.c.bf16 %v47_v13, %v45_v12  ;;  %v1669_v17 = vld [vmem:[%s2353_s3] sm:$0xff]   ;;  %v1666_v18 = vld [vmem:[%s2352_s2 + $0x30] sm:$0xff]  }
   0x7   :  { %1507 = vmatpush3.bf16.msra.mxu0 %v1656_v4  ;;  %1559 = vmatpush3.bf16.msra.mxu1 %v1669_v17 }
   0x8   :  { %1508 = vmatprep.subr.bf16.mxu0 %v1657_v5  ;;  %216 = vmatprep.mubr.bf16.mxu0 %v49_v15 }
   0x9   :  { %1560 = vmatprep.subr.bf16.mxu1 %v1875_v2 }
   0xb   :  { %1509 = vmatpush3.bf16.msra.mxu0 %v1658_v6 }
   0xc   :  { %1510 = vmatprep.subr.bf16.mxu0 %v1659_v7 }
   0xf   :  { %1511 = vmatpush3.bf16.msra.mxu0 %v1660_v8 }
  0x10   :  { %1512 = vmatprep.subr.bf16.mxu0 %v1661_v9 }
  0x13   :  { %1513 = vmatpush3.bf16.msra.mxu0 %v1662_v10 }
  0x14   :  { %1514 = vmatprep.subr.bf16.mxu0 %v1663_v11 }
  0x17   :  { %1515 = vmatpush3.bf16.msra.mxu0 %v1664_v14 }
  0x18   :  { %16 = vsyncpa [#allocation8], 0  ;;  %1516 = vmatprep.subr.bf16.mxu0 %v1665_v16  ;;  %v1667_v19 = vld [vmem:[%s2352_s2 + $0x78] sm:$0xff]   ;;  %v44_v21 = vld [vmem:[%s2350_s0] sm:$0xff]  ;;  %vm38_vm0 = vcmask 254976   ;;  %vm1876_vm1 = vmmov 0   ;;  %v240_v30 = vlaneseq }
  0x19   :  { %v1668_v20 = vld [vmem:[%s2352_s2 + $0x38] sm:$0xff]   ;;  %v46_v22 = vld [vmem:[%s2350_s0 + $0x10] sm:$0xff]  ;;  %v1670_v24 = vld [vmem:[%s2353_s3 + $0x8] sm:$0xff]   ;;  %1566 = vmatprep.mubr.msk.bf16.mxu1 %vm1876_vm1, %v1875_v2  ;;  %vm227_vm2 = vcmask 523264   ;;  %vm346_vm3 = vcmask 261120   ;;  %vm472_vm4 = vcmask 1041409  }
  0x1a   :  { %v48_v23 = vpack.c.bf16 %v46_v22, %v44_v21  ;;  %1561 = vmatpush3.bf16.msra.mxu1 %v1670_v24  ;;  %v1671_v25 = vld [vmem:[%s2353_s3 + $0x10] sm:$0xff]   ;;  %v1672_v26 = vld [vmem:[%s2353_s3 + $0x18] sm:$0xff]   ;;  %v36_v27 = vld [vmem:[%s2351_s1] sm:$0x3]  ;;  %v2040_v32 = vshrl.u32 %v240_v30, 7  ;;  %vm460_vm5 = vcmask 253952  }
  0x1b   :  { %1517 = vmatpush3.bf16.msra.mxu0 %v1666_v18  ;;  %1562 = vmatprep.subr.bf16.mxu1 %v1875_v2  ;;  %39 = vst.msk [vmem:[#allocation4] sm:$0x3] %vm38_vm0, %v36_v27  ;;  %v2023_v28 = vld [vmem:[%s2354_s4] sm:$0xff]   ;;  %v2032_v29 = vld [vmem:[%s2354_s4 + $0x8] sm:$0xff]   ;;  %s1877_s4 = smov 64  }
  0x1c   :  { %1518 = vmatprep.subr.bf16.mxu0 %v1667_v19  ;;  %v37_v31 = vld [vmem:[%s2351_s1 + $0x2] sm:$0x3]  ;;  %v42_v33 = vld [vmem:[%s2356_s6] sm:$0x3]  ;;  %v242_v34 = vsub.s32 0, %v2040_v32  ;;  %v246_v35 = vsub.s32 1, %v2040_v32 }
  0x1d   :  { %40 = vst.msk [vmem:[#allocation4 + $0x2] sm:$0x3] %vm38_vm0, %v37_v31  ;;  %s1878_s1 = smov 32   ;;  %v1453_v41 = vld [vmem:[%s2356_s6] ss:$0 sm:$0xff] }
  0x1e   :  { %1563 = vmatpush3.bf16.msra.mxu1 %v1671_v25  ;;  %v243_v36 = vrot.slane %v42_v33, %v242_v34  ;;  %v247_v37 = vrot.slane %v42_v33, %v246_v35 }
  0x1f   :  { %1519 = vmatpush3.bf16.msra.mxu0 %v1668_v20  ;;  %1564 = vmatprep.subr.bf16.mxu1 %v1875_v2 }
  0x20   :  { %1586 = vmatprep.subr.bf16.mxu0 %v1875_v2  ;;  %272 = vrot.lane.b32.xlu0 %v243_v36, %s1877_s4 }
  0x22   :  { %217 = vmatmul.mubr.bf16.vlgmr.msra.gmra.mrb[0].mxu0 %v48_v23  ;;  %1565 = vmatpush3.bf16.msra.mxu1 %v1672_v26  ;;  %v328_v52 = vld [vmem:[#allocation4] sm:$0x3] }
  0x23   :  { %1570 = vmatprep.subr.bf16.mxu1 %v1875_v2  ;;  %1590 = vmatprep.mubr.msk.bf16.mxu0 %vm1876_vm1, %v1875_v2  ;;  %v333_v53 = vpack.c.bf16 %v328_v52, %v328_v52 }
  0x24   :  { %1587 = vmatpush3.bf16.msra.mxu0 %v2023_v28  ;;  %v330_v38 = vld [vmem:[#allocation4 + $0x2] sm:$0x3]  ;;  %274 = vrot.lane.b32.xlu0 %v247_v37, %s1877_s4 }
  0x25   :  { %1588 = vmatprep.subr.bf16.mxu0 %v1875_v2  ;;  %v411_v39 = vrot.slane %v330_v38, 1 }
  0x28   :  { %1589 = vmatpush3.bf16.msra.mxu0 %v2032_v29  ;;  %414 = vrot.lane.b32.xlu0 %v411_v39, %s1878_s1 }
  0x29   :  { %1602 = vmatprep.subr.bf16.mxu0 %v1875_v2 }
  0x92   :  { %v273_v54 = vpop.permute.xlu0 %272 }
  0x96   :  { %v275_v55 = vpop.permute.xlu0 %274 }
  0x97   :  { %v276_v56 = vsel %vm227_vm2, %v273_v54, %v275_v55 }
  0x9a   :  { %v415_v23 = vpop.permute.xlu0 %414 }
  0xf5   :  { %v1520_v40 = vpop.f32.mrb[0].mxu0 }
  0xf6   :  { %v1521_v42 = vpop.f32.mrb[1].mxu0 }
  0xf7   :  { %v1522_v43 = vadd.f32 %v1521_v42, %v1520_v40  ;;  %v1523_v44 = vpop.f32.mrb[2].mxu0 }
  0xf8   :  { %v1524_v45 = vpop.f32.mrb[3].mxu0 }
  0xf9   :  { %v219_v46 = vadd.f32 %v1522_v43, %v1453_v41  ;;  %v1525_v47 = vadd.f32 %v1524_v45, %v1523_v44 }
  0xfb   :  { %v225_v48 = vmax.f32 %v219_v46, 0.0  ;;  %v222_v49 = vadd.f32 %v1525_v47, %v1453_v41 }
  0xfd   :  { %228 = vst.msk [vmem:[#allocation7] sm:$0xff] %vm227_vm2, %v225_v48  ;;  %v226_v50 = vmax.f32 %v222_v49, 0.0 }
  0xff   :  { %229 = vst.msk [vmem:[#allocation7 + $0x8] sm:$0xff] %vm227_vm2, %v226_v50  ;;  %v230_v51 = vpack.c.bf16 %v226_v50, %v225_v48 }
 0x101   :  { %1567 = vmatmul.mubr.msk.bf16.vlgmr.msra.gmra.mrb[0].mxu1 %vm227_vm2, %v230_v51 }
 0x102   :  { %1571 = vmatpush3.bf16.msra.mxu1 %v2023_v28  ;;  %1574 = vmatprep.mubr.msk.bf16.mxu1 %vm1876_vm1, %v1875_v2 }
 0x103   :  { %1572 = vmatprep.subr.bf16.mxu1 %v1875_v2 }
 0x106   :  { %1573 = vmatpush3.bf16.msra.mxu1 %v2032_v29 }
 0x107   :  { %1578 = vmatprep.subr.bf16.mxu1 %v1875_v2 }
 0x109   :  { %1575 = vmatmul.mubr.msk.bf16.vlgmr.msra.gmra.mrb[4].mxu1 %vm346_vm3, %v333_v53 }
 0x10a   :  { %1579 = vmatpush3.bf16.msra.mxu1 %v2023_v28  ;;  %1582 = vmatprep.mubr.msk.bf16.mxu1 %vm1876_vm1, %v1875_v2 }
 0x10b   :  { %1580 = vmatprep.subr.bf16.mxu1 %v1875_v2 }
 0x10e   :  { %1581 = vmatpush3.bf16.msra.mxu1 %v2032_v29 }
 0x10f   :  { %1594 = vmatprep.subr.bf16.mxu1 %v1875_v2 }
 0x1d4   :  { %v315_v57 = vpop.f32.mrb[0].mxu1 }
 0x1d5   :  { %v316_v58 = vadd.f32 %v315_v57, %v276_v56  ;;  %v1568_v59 = vpop.f32.mrb[1].mxu1 }
 0x1d6   :  { %v318_v60 = vpop.f32.mrb[2].mxu1 }
 0x1d7   :  { %322 = vst [vmem:[#allocation2] sm:$0xff] %v316_v58  ;;  %v319_v61 = vadd.f32 %v318_v60, %v276_v56  ;;  %v1569_v62 = vpop.f32.mrb[3].mxu1 }
 0x1d9   :  { %323 = vst [vmem:[#allocation2 + $0x8] sm:$0xff] %v319_v61 }
 0x1dc   :  { %v384_v63 = vpop.f32.mrb[4].mxu1 }
 0x1dd   :  { %v391_v0 = vrot.slane %v384_v63, 1  ;;  %v1576_v1 = vpop.f32.mrb[5].mxu1 }
 0x1de   :  { %v387_v3 = vpop.f32.mrb[6].mxu1  ;;  %v331_v6 = vld [vmem:[#allocation2] sm:$0x1]  ;;  %v463_v50 = vld [vmem:[#allocation2 + $0x1] sm:$0x1] }
 0x1df   :  { %v1577_v4 = vpop.f32.mrb[7].mxu1  ;;  %v394_v8 = vadd.f32 %v384_v63, %v331_v6 }
 0x1e0   :  { %v332_v5 = vld [vmem:[#allocation2 + $0x8] sm:$0x1]  ;;  %v464_v55 = vld [vmem:[#allocation2 + $0x9] sm:$0x1] }
 0x1e1   :  { %v395_v7 = vadd.f32 %v391_v0, %v332_v5  ;;  %v1478_v12 = vmul.f32 -1.442695, %v394_v8 }
 0x1e3   :  { %1677 = vtanh.f32 %v395_v7  ;;  %v1479_v11 = vmul.f32 -1.442695, %v395_v7 }
 0x1e4   :  { %1679 = vtanh.f32 %v394_v8 }
 0x1e5   :  { %1681 = vpow2.f32 %v1479_v11 }
 0x1e6   :  { %1683 = vpow2.f32 %v1478_v12 }
 0x1ed   :  { %v1678_v9 = vpop.eup %1677 }
 0x1ee   :  { %424 = vrot.lane.b32.xlu1 %v1678_v9, %s1877_s4  ;;  %v1680_v10 = vpop.eup %1679 }
 0x1ef   :  { %v1682_v13 = vpop.eup %1681 }
 0x1f0   :  { %v403_v14 = vadd.f32 1.0, %v1682_v13  ;;  %v1684_v15 = vpop.eup %1683 }
 0x1f1   :  { %v402_v16 = vadd.f32 1.0, %v1684_v15 }
 0x1f2   :  { %422 = vrot.lane.b32.xlu1 %v1680_v10, %s1877_s4  ;;  %1685 = vrcp.f32 %v403_v14 }
 0x1f3   :  { %1687 = vrcp.f32 %v402_v16 }
 0x1f6   :  { %412 = vrot.lane.b32.xlu1 %v330_v38, %s1878_s1 }
 0x1fc   :  { %v1686_v17 = vpop.eup %1685 }
 0x1fd   :  { %v1688_v20 = vpop.eup %1687  ;;  %v419_v24 = vmul.f32 %v1686_v17, %v415_v23 }
 0x260   :  { %v425_v18 = vpop.permute.xlu1 %424 }
 0x261   :  { %v429_v19 = vmul.f32 %v1686_v17, %v425_v18 }
 0x263   :  { %434 = vrot.lane.b32.xlu0 %v429_v19, %s1878_s1 }
 0x264   :  { %v423_v21 = vpop.permute.xlu1 %422 }
 0x265   :  { %v428_v22 = vmul.f32 %v1688_v20, %v423_v21 }
 0x267   :  { %432 = vrot.lane.b32.xlu1 %v428_v22, %s1878_s1 }
 0x268   :  { %v413_v25 = vpop.permute.xlu1 %412 }
 0x269   :  { %v418_v30 = vmul.f32 %v1688_v20, %v413_v25 }
 0x2d5   :  { %v435_v26 = vpop.permute.xlu0 %434 }
 0x2d6   :  { %v2079_v27 = vadd.f32 %v435_v26, %v419_v24 }
 0x2d8   :  { %1689 = vtanh.f32 %v2079_v27 }
 0x2d9   :  { %v433_v31 = vpop.permute.xlu1 %432 }
 0x2da   :  { %v438_v33 = vadd.f32 %v433_v31, %v418_v30 }
 0x2dc   :  { %1691 = vtanh.f32 %v438_v33 }
 0x2e2   :  { %v1690_v36 = vpop.eup %1689 }
 0x2e3   :  { %446 = vrot.lane.b32.xlu0 %v1690_v36, %s1877_s4 }
 0x2e6   :  { %v1692_v37 = vpop.eup %1691 }
 0x2e7   :  { %444 = vrot.lane.b32.xlu1 %v1692_v37, %s1877_s4 }
 0x355   :  { %v447_v38 = vpop.permute.xlu0 %446 }
 0x356   :  { %v2084_v39 = vmul.f32 %v1686_v17, %v447_v38 }
 0x358   :  { %v466_v40 = vpack.c.bf16 %v2084_v39, %v2084_v39 }
 0x359   :  { %v445_v41 = vpop.permute.xlu1 %444 }
 0x35a   :  { %v470_v42 = vunpack.c.l.b16 %v466_v40  ;;  %v2088_v43 = vmul.f32 %v1688_v20, %v445_v41  ;;  %v585_v41 = vld [vmem:[#allocation2 + $0xa] sm:$0x1] }
 0x35c   :  { %v465_v44 = vpack.c.bf16 %v2088_v43, %v2088_v43  ;;  %v471_v45 = vrot.slane %v470_v42, 7 }
 0x35e   :  { %v469_v46 = vunpack.c.l.b16 %v465_v44 }
 0x360   :  { %v473_v47 = vsel %vm472_vm4, %v471_v45, %v469_v46 }
 0x361   :  { %v474_v48 = vpack.c.b16 %v473_v47, %v473_v47 }
 0x363   :  { %475 = vrot.lane.b32.xlu0 %v474_v48, %s1878_s1 }
 0x3d5   :  { %v476_v49 = vpop.permute.xlu0 %475 }
 0x3d6   :  { %1583 = vmatmul.mubr.msk.bf16.vlgmr.msra.gmra.mrb[8].mxu1 %vm346_vm3, %v476_v49 }
 0x3d7   :  { %1595 = vmatpush3.bf16.msra.mxu1 %v2023_v28  ;;  %1598 = vmatprep.mubr.msk.bf16.mxu1 %vm1876_vm1, %v1875_v2 }
 0x3d8   :  { %1596 = vmatprep.subr.bf16.mxu1 %v1875_v2 }
 0x3db   :  { %1597 = vmatpush3.bf16.msra.mxu1 %v2032_v29 }
 0x3dc   :  { %1610 = vmatprep.subr.bf16.mxu1 %v1875_v2 }
 0x4a9   :  { %v514_v51 = vpop.f32.mrb[8].mxu1 }
 0x4aa   :  { %v521_v52 = vrot.slane %v514_v51, 1  ;;  %v524_v53 = vadd.f32 %v514_v51, %v463_v50  ;;  %v1584_v54 = vpop.f32.mrb[9].mxu1 }
 0x4ab   :  { %v517_v56 = vpop.f32.mrb[10].mxu1 }
 0x4ac   :  { %v525_v57 = vadd.f32 %v521_v52, %v464_v55  ;;  %1693 = vtanh.f32 %v524_v53  ;;  %v1585_v58 = vpop.f32.mrb[11].mxu1  ;;  %v1481_v61 = vmul.f32 -1.442695, %v524_v53 }
 0x4ae   :  { %1695 = vtanh.f32 %v525_v57  ;;  %v1482_v62 = vmul.f32 -1.442695, %v525_v57 }
 0x4af   :  { %1697 = vpow2.f32 %v1481_v61 }
 0x4b0   :  { %1699 = vpow2.f32 %v1482_v62 }
 0x4b6   :  { %v1694_v59 = vpop.eup %1693 }
 0x4b7   :  { %544 = vrot.lane.b32.xlu0 %v1694_v59, %s1877_s4 }
 0x4b8   :  { %v1696_v60 = vpop.eup %1695 }
 0x4b9   :  { %546 = vrot.lane.b32.xlu1 %v1696_v60, %s1877_s4  ;;  %v1698_v63 = vpop.eup %1697 }
 0x4ba   :  { %v1700_v0 = vpop.eup %1699  ;;  %v532_v1 = vadd.f32 1.0, %v1698_v63 }
 0x4bb   :  { %v533_v3 = vadd.f32 1.0, %v1700_v0 }
 0x4bc   :  { %1701 = vrcp.f32 %v532_v1 }
 0x4bd   :  { %1703 = vrcp.f32 %v533_v3 }
 0x4c6   :  { %v1702_v4 = vpop.eup %1701 }
 0x4c7   :  { %v1704_v7 = vpop.eup %1703  ;;  %v540_v10 = vmul.f32 %v1702_v4, %v438_v33  ;;  %v584_v33 = vld [vmem:[#allocation2 + $0x2] sm:$0x1] }
 0x4c8   :  { %v541_v13 = vmul.f32 %v1704_v7, %v2079_v27 }
 0x529   :  { %v545_v5 = vpop.permute.xlu0 %544 }
 0x52a   :  { %v550_v6 = vmul.f32 %v1702_v4, %v545_v5 }
 0x52b   :  { %v547_v8 = vpop.permute.xlu1 %546 }
 0x52c   :  { %554 = vrot.lane.b32.xlu0 %v550_v6, %s1878_s1  ;;  %v551_v9 = vmul.f32 %v1704_v7, %v547_v8 }
 0x52e   :  { %556 = vrot.lane.b32.xlu1 %v551_v9, %s1878_s1 }
 0x59e   :  { %v555_v11 = vpop.permute.xlu0 %554 }
 0x59f   :  { %v560_v12 = vadd.f32 %v555_v11, %v540_v10 }
 0x5a0   :  { %v557_v14 = vpop.permute.xlu1 %556 }
 0x5a1   :  { %1705 = vtanh.f32 %v560_v12  ;;  %v561_v15 = vadd.f32 %v557_v14, %v541_v13 }
 0x5a3   :  { %1707 = vtanh.f32 %v561_v15 }
 0x5ab   :  { %v1706_v16 = vpop.eup %1705 }
 0x5ac   :  { %566 = vrot.lane.b32.xlu0 %v1706_v16, %s1877_s4 }
 0x5ad   :  { %v1708_v17 = vpop.eup %1707 }
 0x5ae   :  { %568 = vrot.lane.b32.xlu1 %v1708_v17, %s1877_s4  ;;  %v704_v17 = vld [vmem:[#allocation2 + $0x3] sm:$0x1] }
 0x61e   :  { %v567_v18 = vpop.permute.xlu0 %566 }
 0x61f   :  { %v2108_v19 = vmul.f32 %v1702_v4, %v567_v18 }
 0x620   :  { %v569_v20 = vpop.permute.xlu1 %568 }
 0x621   :  { %v2110_v21 = vmul.f32 %v1704_v7, %v569_v20  ;;  %v586_v22 = vpack.c.bf16 %v2108_v19, %v2108_v19 }
 0x623   :  { %v587_v23 = vpack.c.bf16 %v2110_v21, %v2110_v21  ;;  %v590_v25 = vunpack.c.l.b16 %v586_v22 }
 0x625   :  { %v591_v24 = vunpack.c.l.b16 %v587_v23 }
 0x627   :  { %v592_v26 = vrot.slane %v591_v24, 7  ;;  %v705_v24 = vld [vmem:[#allocation2 + $0xb] sm:$0x1] }
 0x629   :  { %v593_v27 = vsel %vm472_vm4, %v592_v26, %v590_v25 }
 0x62a   :  { %v594_v30 = vpack.c.b16 %v593_v27, %v593_v27 }
 0x62c   :  { %595 = vrot.lane.b32.xlu1 %v594_v30, %s1878_s1 }
 0x69e   :  { %v596_v31 = vpop.permute.xlu1 %595 }
 0x69f   :  { %1591 = vmatmul.mubr.msk.bf16.vlgmr.msra.gmra.mrb[4].mxu0 %vm346_vm3, %v596_v31 }
 0x6a0   :  { %1603 = vmatpush3.bf16.msra.mxu0 %v2023_v28  ;;  %1606 = vmatprep.mubr.msk.bf16.mxu0 %vm1876_vm1, %v1875_v2 }
 0x6a1   :  { %1604 = vmatprep.subr.bf16.mxu0 %v1875_v2 }
 0x6a4   :  { %1605 = vmatpush3.bf16.msra.mxu0 %v2032_v29 }
 0x6a5   :  { %1618 = vmatprep.subr.bf16.mxu0 %v1875_v2 }
 0x772   :  { %v634_v36 = vpop.f32.mrb[4].mxu0 }
 0x773   :  { %v641_v37 = vrot.slane %v634_v36, 1  ;;  %v644_v38 = vadd.f32 %v634_v36, %v584_v33  ;;  %v1592_v40 = vpop.f32.mrb[5].mxu0 }
 0x774   :  { %v637_v42 = vpop.f32.mrb[6].mxu0 }
 0x775   :  { %v645_v44 = vadd.f32 %v641_v37, %v585_v41  ;;  %1709 = vtanh.f32 %v644_v38  ;;  %v1593_v45 = vpop.f32.mrb[7].mxu0  ;;  %v1484_v48 = vmul.f32 -1.442695, %v644_v38 }
 0x777   :  { %1711 = vtanh.f32 %v645_v44  ;;  %v1485_v49 = vmul.f32 -1.442695, %v645_v44 }
 0x778   :  { %1713 = vpow2.f32 %v1484_v48 }
 0x779   :  { %1715 = vpow2.f32 %v1485_v49 }
 0x77f   :  { %v1710_v46 = vpop.eup %1709 }
 0x780   :  { %664 = vrot.lane.b32.xlu1 %v1710_v46, %s1877_s4 }
 0x781   :  { %v1712_v47 = vpop.eup %1711 }
 0x782   :  { %666 = vrot.lane.b32.xlu0 %v1712_v47, %s1877_s4  ;;  %v1714_v50 = vpop.eup %1713 }
 0x783   :  { %v1716_v51 = vpop.eup %1715  ;;  %v652_v52 = vadd.f32 1.0, %v1714_v50 }
 0x784   :  { %v653_v53 = vadd.f32 1.0, %v1716_v51 }
 0x785   :  { %1717 = vrcp.f32 %v652_v52 }
 0x786   :  { %1719 = vrcp.f32 %v653_v53 }
 0x78f   :  { %v1718_v54 = vpop.eup %1717 }
 0x790   :  { %v1720_v57 = vpop.eup %1719  ;;  %v660_v60 = vmul.f32 %v1718_v54, %v560_v12 }
 0x791   :  { %v661_v63 = vmul.f32 %v1720_v57, %v561_v15 }
 0x7f2   :  { %v665_v55 = vpop.permute.xlu1 %664 }
 0x7f3   :  { %v670_v56 = vmul.f32 %v1718_v54, %v665_v55 }
 0x7f4   :  { %v667_v58 = vpop.permute.xlu0 %666 }
 0x7f5   :  { %674 = vrot.lane.b32.xlu1 %v670_v56, %s1878_s1  ;;  %v671_v59 = vmul.f32 %v1720_v57, %v667_v58 }
 0x7f7   :  { %676 = vrot.lane.b32.xlu0 %v671_v59, %s1878_s1 }
 0x867   :  { %v675_v61 = vpop.permute.xlu1 %674 }
 0x868   :  { %v680_v62 = vadd.f32 %v675_v61, %v660_v60 }
 0x869   :  { %v677_v0 = vpop.permute.xlu0 %676 }
 0x86a   :  { %1721 = vtanh.f32 %v680_v62  ;;  %v681_v1 = vadd.f32 %v677_v0, %v661_v63 }
 0x86c   :  { %1723 = vtanh.f32 %v681_v1 }
 0x874   :  { %v1722_v3 = vpop.eup %1721 }
 0x875   :  { %686 = vrot.lane.b32.xlu1 %v1722_v3, %s1877_s4 }
 0x876   :  { %v1724_v4 = vpop.eup %1723 }
 0x877   :  { %688 = vrot.lane.b32.xlu0 %v1724_v4, %s1877_s4 }
 0x8e7   :  { %v687_v5 = vpop.permute.xlu1 %686 }
 0x8e8   :  { %v2131_v6 = vmul.f32 %v1718_v54, %v687_v5 }
 0x8e9   :  { %v689_v7 = vpop.permute.xlu0 %688 }
 0x8ea   :  { %v2133_v8 = vmul.f32 %v1720_v57, %v689_v7  ;;  %v706_v9 = vpack.c.bf16 %v2131_v6, %v2131_v6  ;;  %v824_v7 = vld [vmem:[#allocation2 + $0x4] sm:$0x1] }
 0x8ec   :  { %v707_v10 = vpack.c.bf16 %v2133_v8, %v2133_v8  ;;  %v710_v12 = vunpack.c.l.b16 %v706_v9 }
 0x8ee   :  { %v711_v11 = vunpack.c.l.b16 %v707_v10 }
 0x8f0   :  { %v712_v13 = vrot.slane %v711_v11, 7 }
 0x8f2   :  { %v713_v14 = vsel %vm472_vm4, %v712_v13, %v710_v12  ;;  %v825_v13 = vld [vmem:[#allocation2 + $0xc] sm:$0x1] }
 0x8f3   :  { %v714_v15 = vpack.c.b16 %v713_v14, %v713_v14 }
 0x8f5   :  { %715 = vrot.lane.b32.xlu0 %v714_v15, %s1878_s1 }
 0x967   :  { %v716_v16 = vpop.permute.xlu0 %715 }
 0x968   :  { %1599 = vmatmul.mubr.msk.bf16.vlgmr.msra.gmra.mrb[12].mxu1 %vm346_vm3, %v716_v16 }
 0x969   :  { %1611 = vmatpush3.bf16.msra.mxu1 %v2023_v28  ;;  %1614 = vmatprep.mubr.msk.bf16.mxu1 %vm1876_vm1, %v1875_v2 }
 0x96a   :  { %1612 = vmatprep.subr.bf16.mxu1 %v1875_v2 }
 0x96d   :  { %1613 = vmatpush3.bf16.msra.mxu1 %v2032_v29 }
 0x96e   :  { %1626 = vmatprep.subr.bf16.mxu1 %v1875_v2 }
 0xa3b   :  { %v754_v18 = vpop.f32.mrb[12].mxu1 }
 0xa3c   :  { %v761_v20 = vrot.slane %v754_v18, 1  ;;  %v764_v22 = vadd.f32 %v754_v18, %v704_v17  ;;  %v1600_v23 = vpop.f32.mrb[13].mxu1 }
 0xa3d   :  { %v757_v25 = vpop.f32.mrb[14].mxu1 }
 0xa3e   :  { %v765_v26 = vadd.f32 %v761_v20, %v705_v24  ;;  %1725 = vtanh.f32 %v764_v22  ;;  %v1601_v27 = vpop.f32.mrb[15].mxu1  ;;  %v1487_v33 = vmul.f32 -1.442695, %v764_v22 }
 0xa40   :  { %1727 = vtanh.f32 %v765_v26  ;;  %v1488_v36 = vmul.f32 -1.442695, %v765_v26 }
 0xa41   :  { %1729 = vpow2.f32 %v1487_v33 }
 0xa42   :  { %1731 = vpow2.f32 %v1488_v36 }
 0xa48   :  { %v1726_v30 = vpop.eup %1725 }
 0xa49   :  { %784 = vrot.lane.b32.xlu0 %v1726_v30, %s1877_s4 }
 0xa4a   :  { %v1728_v31 = vpop.eup %1727 }
 0xa4b   :  { %786 = vrot.lane.b32.xlu1 %v1728_v31, %s1877_s4  ;;  %v1730_v37 = vpop.eup %1729 }
 0xa4c   :  { %v1732_v38 = vpop.eup %1731  ;;  %v772_v40 = vadd.f32 1.0, %v1730_v37 }
 0xa4d   :  { %v773_v41 = vadd.f32 1.0, %v1732_v38 }
 0xa4e   :  { %1733 = vrcp.f32 %v772_v40 }
 0xa4f   :  { %1735 = vrcp.f32 %v773_v41 }
 0xa58   :  { %v1734_v42 = vpop.eup %1733 }
 0xa59   :  { %v1736_v46 = vpop.eup %1735  ;;  %v780_v49 = vmul.f32 %v1734_v42, %v680_v62 }
 0xa5a   :  { %v781_v52 = vmul.f32 %v1736_v46, %v681_v1 }
 0xabb   :  { %v785_v44 = vpop.permute.xlu0 %784 }
 0xabc   :  { %v790_v45 = vmul.f32 %v1734_v42, %v785_v44 }
 0xabd   :  { %v787_v47 = vpop.permute.xlu1 %786 }
 0xabe   :  { %794 = vrot.lane.b32.xlu0 %v790_v45, %s1878_s1  ;;  %v791_v48 = vmul.f32 %v1736_v46, %v787_v47 }
 0xac0   :  { %796 = vrot.lane.b32.xlu1 %v791_v48, %s1878_s1 }
 0xb30   :  { %v795_v50 = vpop.permute.xlu0 %794 }
 0xb31   :  { %v800_v51 = vadd.f32 %v795_v50, %v780_v49 }
 0xb32   :  { %v797_v53 = vpop.permute.xlu1 %796 }
 0xb33   :  { %1737 = vtanh.f32 %v800_v51  ;;  %v801_v54 = vadd.f32 %v797_v53, %v781_v52 }
 0xb35   :  { %1739 = vtanh.f32 %v801_v54 }
 0xb3d   :  { %v1738_v55 = vpop.eup %1737 }
 0xb3e   :  { %806 = vrot.lane.b32.xlu0 %v1738_v55, %s1877_s4 }
 0xb3f   :  { %v1740_v56 = vpop.eup %1739 }
 0xb40   :  { %808 = vrot.lane.b32.xlu1 %v1740_v56, %s1877_s4 }
 0xbb0   :  { %v807_v57 = vpop.permute.xlu0 %806 }
 0xbb1   :  { %v2154_v58 = vmul.f32 %v1734_v42, %v807_v57 }
 0xbb2   :  { %v809_v59 = vpop.permute.xlu1 %808 }
 0xbb3   :  { %v2156_v60 = vmul.f32 %v1736_v46, %v809_v59  ;;  %v826_v61 = vpack.c.bf16 %v2154_v58, %v2154_v58 }
 0xbb5   :  { %v827_v62 = vpack.c.bf16 %v2156_v60, %v2156_v60  ;;  %v830_v0 = vunpack.c.l.b16 %v826_v61 }
 0xbb7   :  { %v831_v63 = vunpack.c.l.b16 %v827_v62  ;;  %v944_v62 = vld [vmem:[#allocation2 + $0x5] sm:$0x1] }
 0xbb9   :  { %v832_v1 = vrot.slane %v831_v63, 7 }
 0xbbb   :  { %v833_v3 = vsel %vm472_vm4, %v832_v1, %v830_v0 }
 0xbbc   :  { %v834_v4 = vpack.c.b16 %v833_v3, %v833_v3 }
 0xbbe   :  { %835 = vrot.lane.b32.xlu1 %v834_v4, %s1878_s1  ;;  %v945_v4 = vld [vmem:[#allocation2 + $0xd] sm:$0x1] }
 0xc30   :  { %v836_v5 = vpop.permute.xlu1 %835 }
 0xc31   :  { %1607 = vmatmul.mubr.msk.bf16.vlgmr.msra.gmra.mrb[8].mxu0 %vm346_vm3, %v836_v5 }
 0xc32   :  { %1619 = vmatpush3.bf16.msra.mxu0 %v2023_v28  ;;  %1622 = vmatprep.mubr.msk.bf16.mxu0 %vm1876_vm1, %v1875_v2 }
 0xc33   :  { %1620 = vmatprep.subr.bf16.mxu0 %v1875_v2 }
 0xc36   :  { %1621 = vmatpush3.bf16.msra.mxu0 %v2032_v29 }
 0xc37   :  { %1634 = vmatprep.subr.bf16.mxu0 %v1875_v2 }
 0xd04   :  { %v874_v9 = vpop.f32.mrb[8].mxu0 }
 0xd05   :  { %v881_v10 = vrot.slane %v874_v9, 1  ;;  %v884_v11 = vadd.f32 %v874_v9, %v824_v7  ;;  %v1608_v12 = vpop.f32.mrb[9].mxu0 }
 0xd06   :  { %v877_v14 = vpop.f32.mrb[10].mxu0 }
 0xd07   :  { %v885_v15 = vadd.f32 %v881_v10, %v825_v13  ;;  %1741 = vtanh.f32 %v884_v11  ;;  %v1609_v16 = vpop.f32.mrb[11].mxu0  ;;  %v1490_v20 = vmul.f32 -1.442695, %v884_v11 }
 0xd09   :  { %1743 = vtanh.f32 %v885_v15  ;;  %v1491_v22 = vmul.f32 -1.442695, %v885_v15 }
 0xd0a   :  { %1745 = vpow2.f32 %v1490_v20 }
 0xd0b   :  { %1747 = vpow2.f32 %v1491_v22 }
 0xd11   :  { %v1742_v17 = vpop.eup %1741 }
 0xd12   :  { %904 = vrot.lane.b32.xlu1 %v1742_v17, %s1877_s4 }
 0xd13   :  { %v1744_v18 = vpop.eup %1743 }
 0xd14   :  { %906 = vrot.lane.b32.xlu0 %v1744_v18, %s1877_s4  ;;  %v1746_v23 = vpop.eup %1745 }
 0xd15   :  { %v1748_v24 = vpop.eup %1747  ;;  %v892_v25 = vadd.f32 1.0, %v1746_v23 }
 0xd16   :  { %v893_v26 = vadd.f32 1.0, %v1748_v24 }
 0xd17   :  { %1749 = vrcp.f32 %v892_v25 }
 0xd18   :  { %1751 = vrcp.f32 %v893_v26 }
 0xd21   :  { %v1750_v27 = vpop.eup %1749 }
 0xd22   :  { %v1752_v33 = vpop.eup %1751  ;;  %v900_v38 = vmul.f32 %v1750_v27, %v800_v51 }
 0xd23   :  { %v901_v42 = vmul.f32 %v1752_v33, %v801_v54 }
 0xd84   :  { %v905_v30 = vpop.permute.xlu1 %904 }
 0xd85   :  { %v910_v31 = vmul.f32 %v1750_v27, %v905_v30 }
 0xd86   :  { %v907_v36 = vpop.permute.xlu0 %906 }
 0xd87   :  { %914 = vrot.lane.b32.xlu1 %v910_v31, %s1878_s1  ;;  %v911_v37 = vmul.f32 %v1752_v33, %v907_v36 }
 0xd89   :  { %916 = vrot.lane.b32.xlu0 %v911_v37, %s1878_s1 }
 0xdf9   :  { %v915_v40 = vpop.permute.xlu1 %914 }
 0xdfa   :  { %v920_v41 = vadd.f32 %v915_v40, %v900_v38 }
 0xdfb   :  { %v917_v44 = vpop.permute.xlu0 %916 }
 0xdfc   :  { %1753 = vtanh.f32 %v920_v41  ;;  %v921_v45 = vadd.f32 %v917_v44, %v901_v42 }
 0xdfe   :  { %1755 = vtanh.f32 %v921_v45 }
 0xe06   :  { %v1754_v46 = vpop.eup %1753 }
 0xe07   :  { %926 = vrot.lane.b32.xlu1 %v1754_v46, %s1877_s4 }
 0xe08   :  { %v1756_v47 = vpop.eup %1755 }
 0xe09   :  { %928 = vrot.lane.b32.xlu0 %v1756_v47, %s1877_s4 }
 0xe79   :  { %v927_v48 = vpop.permute.xlu1 %926 }
 0xe7a   :  { %v2177_v49 = vmul.f32 %v1750_v27, %v927_v48 }
 0xe7b   :  { %v929_v50 = vpop.permute.xlu0 %928 }
 0xe7c   :  { %v2179_v52 = vmul.f32 %v1752_v33, %v929_v50  ;;  %v946_v51 = vpack.c.bf16 %v2177_v49, %v2177_v49 }
 0xe7e   :  { %v947_v53 = vpack.c.bf16 %v2179_v52, %v2179_v52  ;;  %v950_v55 = vunpack.c.l.b16 %v946_v51 }
 0xe80   :  { %v951_v54 = vunpack.c.l.b16 %v947_v53  ;;  %v1064_v53 = vld [vmem:[#allocation2 + $0x6] sm:$0x1] }
 0xe82   :  { %v952_v56 = vrot.slane %v951_v54, 7 }
 0xe84   :  { %v953_v57 = vsel %vm472_vm4, %v952_v56, %v950_v55 }
 0xe85   :  { %v954_v59 = vpack.c.b16 %v953_v57, %v953_v57 }
 0xe87   :  { %955 = vrot.lane.b32.xlu0 %v954_v59, %s1878_s1  ;;  %v1065_v59 = vld [vmem:[#allocation2 + $0xe] sm:$0x1] }
 0xef9   :  { %v956_v61 = vpop.permute.xlu0 %955 }
 0xefa   :  { %1615 = vmatmul.mubr.msk.bf16.vlgmr.msra.gmra.mrb[16].mxu1 %vm346_vm3, %v956_v61 }
 0xefb   :  { %1627 = vmatpush3.bf16.msra.mxu1 %v2023_v28  ;;  %1630 = vmatprep.mubr.msk.bf16.mxu1 %vm1876_vm1, %v1875_v2 }
 0xefc   :  { %1628 = vmatprep.subr.bf16.mxu1 %v1875_v2 }
 0xeff   :  { %1629 = vmatpush3.bf16.msra.mxu1 %v2032_v29 }
 0xfcd   :  { %v994_v63 = vpop.f32.mrb[16].mxu1 }
 0xfce   :  { %v1001_v0 = vrot.slane %v994_v63, 1  ;;  %v1004_v1 = vadd.f32 %v994_v63, %v944_v62  ;;  %v1616_v3 = vpop.f32.mrb[17].mxu1 }
 0xfcf   :  { %v997_v5 = vpop.f32.mrb[18].mxu1 }
 0xfd0   :  { %v1005_v7 = vadd.f32 %v1001_v0, %v945_v4  ;;  %1757 = vtanh.f32 %v1004_v1  ;;  %v1617_v9 = vpop.f32.mrb[19].mxu1  ;;  %v1493_v11 = vmul.f32 -1.442695, %v1004_v1 }
 0xfd2   :  { %1759 = vtanh.f32 %v1005_v7  ;;  %v1494_v12 = vmul.f32 -1.442695, %v1005_v7 }
 0xfd3   :  { %1761 = vpow2.f32 %v1493_v11 }
 0xfd4   :  { %1763 = vpow2.f32 %v1494_v12 }
 0xfda   :  { %v1758_v10 = vpop.eup %1757 }
 0xfdb   :  { %1024 = vrot.lane.b32.xlu0 %v1758_v10, %s1877_s4 }
 0xfdc   :  { %v1760_v28 = vpop.eup %1759 }
 0xfdd   :  { %1026 = vrot.lane.b32.xlu1 %v1760_v28, %s1877_s4  ;;  %v1762_v29 = vpop.eup %1761 }
 0xfde   :  { %v1764_v13 = vpop.eup %1763  ;;  %v1012_v14 = vadd.f32 1.0, %v1762_v29 }
 0xfdf   :  { %v1013_v15 = vadd.f32 1.0, %v1764_v13 }
 0xfe0   :  { %1765 = vrcp.f32 %v1012_v14 }
 0xfe1   :  { %1767 = vrcp.f32 %v1013_v15 }
 0xfea   :  { %v1766_v16 = vpop.eup %1765 }
 0xfeb   :  { %v1768_v20 = vpop.eup %1767  ;;  %v1020_v24 = vmul.f32 %v1766_v16, %v920_v41 }
 0xfec   :  { %v1021_v27 = vmul.f32 %v1768_v20, %v921_v45 }
0x104d   :  { %v1025_v17 = vpop.permute.xlu0 %1024 }
0x104e   :  { %v1030_v18 = vmul.f32 %v1766_v16, %v1025_v17 }
0x104f   :  { %v1027_v22 = vpop.permute.xlu1 %1026 }
0x1050   :  { %1034 = vrot.lane.b32.xlu0 %v1030_v18, %s1878_s1  ;;  %v1031_v23 = vmul.f32 %v1768_v20, %v1027_v22 }
0x1052   :  { %1036 = vrot.lane.b32.xlu1 %v1031_v23, %s1878_s1 }
0x10c2   :  { %v1035_v25 = vpop.permute.xlu0 %1034 }
0x10c3   :  { %v1040_v26 = vadd.f32 %v1035_v25, %v1020_v24 }
0x10c4   :  { %v1037_v30 = vpop.permute.xlu1 %1036 }
0x10c5   :  { %1769 = vtanh.f32 %v1040_v26  ;;  %v1041_v31 = vadd.f32 %v1037_v30, %v1021_v27 }
0x10c7   :  { %1771 = vtanh.f32 %v1041_v31 }
0x10cf   :  { %v1770_v33 = vpop.eup %1769 }
0x10d0   :  { %1046 = vrot.lane.b32.xlu0 %v1770_v33, %s1877_s4 }
0x10d1   :  { %v1772_v36 = vpop.eup %1771 }
0x10d2   :  { %1048 = vrot.lane.b32.xlu1 %v1772_v36, %s1877_s4 }
0x1142   :  { %v1047_v37 = vpop.permute.xlu0 %1046 }
0x1143   :  { %v2199_v38 = vmul.f32 %v1766_v16, %v1047_v37 }
0x1144   :  { %v1049_v40 = vpop.permute.xlu1 %1048 }
0x1145   :  { %v2201_v42 = vmul.f32 %v1768_v20, %v1049_v40  ;;  %v1066_v41 = vpack.c.bf16 %v2199_v38, %v2199_v38 }
0x1147   :  { %v1067_v44 = vpack.c.bf16 %v2201_v42, %v2201_v42  ;;  %v1070_v46 = vunpack.c.l.b16 %v1066_v41 }
0x1149   :  { %v1071_v45 = vunpack.c.l.b16 %v1067_v44 }
0x114b   :  { %v1072_v47 = vrot.slane %v1071_v45, 7 }
0x114d   :  { %v1073_v48 = vsel %vm472_vm4, %v1072_v47, %v1070_v46  ;;  %v1184_v46 = vld [vmem:[#allocation2 + $0x7] sm:$0x1] }
0x114e   :  { %v1074_v50 = vpack.c.b16 %v1073_v48, %v1073_v48 }
0x1150   :  { %1075 = vrot.lane.b32.xlu1 %v1074_v50, %s1878_s1 }
0x11c2   :  { %v1076_v51 = vpop.permute.xlu1 %1075 }
0x11c3   :  { %1623 = vmatmul.mubr.msk.bf16.vlgmr.msra.gmra.mrb[12].mxu0 %vm346_vm3, %v1076_v51 }
0x11c4   :  { %1638 = vmatprep.mubr.msk.bf16.mxu0 %vm1876_vm1, %v1875_v2 }
0x1296   :  { %v1114_v54 = vpop.f32.mrb[12].mxu0 }
0x1297   :  { %v1121_v55 = vrot.slane %v1114_v54, 1  ;;  %v1124_v56 = vadd.f32 %v1114_v54, %v1064_v53  ;;  %v1624_v57 = vpop.f32.mrb[13].mxu0  ;;  %v1185_v53 = vld [vmem:[#allocation2 + $0xf] sm:$0x1] }
0x1298   :  { %v1117_v61 = vpop.f32.mrb[14].mxu0 }
0x1299   :  { %v1125_v62 = vadd.f32 %v1121_v55, %v1065_v59  ;;  %1773 = vtanh.f32 %v1124_v56  ;;  %v1625_v63 = vpop.f32.mrb[15].mxu0  ;;  %v1496_v3 = vmul.f32 -1.442695, %v1124_v56 }
0x129b   :  { %1775 = vtanh.f32 %v1125_v62  ;;  %v1497_v4 = vmul.f32 -1.442695, %v1125_v62 }
0x129c   :  { %1777 = vpow2.f32 %v1496_v3 }
0x129d   :  { %1779 = vpow2.f32 %v1497_v4 }
0x12a3   :  { %v1774_v0 = vpop.eup %1773 }
0x12a4   :  { %1144 = vrot.lane.b32.xlu1 %v1774_v0, %s1877_s4 }
0x12a5   :  { %v1776_v1 = vpop.eup %1775 }
0x12a6   :  { %1146 = vrot.lane.b32.xlu0 %v1776_v1, %s1877_s4  ;;  %v1778_v5 = vpop.eup %1777 }
0x12a7   :  { %v1780_v7 = vpop.eup %1779  ;;  %v1132_v9 = vadd.f32 1.0, %v1778_v5 }
0x12a8   :  { %v1133_v10 = vadd.f32 1.0, %v1780_v7 }
0x12a9   :  { %1781 = vrcp.f32 %v1132_v9 }
0x12aa   :  { %1783 = vrcp.f32 %v1133_v10 }
0x12b3   :  { %v1782_v28 = vpop.eup %1781 }
0x12b4   :  { %v1784_v29 = vpop.eup %1783  ;;  %v1140_v15 = vmul.f32 %v1782_v28, %v1040_v26 }
0x12b5   :  { %v1141_v18 = vmul.f32 %v1784_v29, %v1041_v31 }
0x1316   :  { %v1145_v11 = vpop.permute.xlu1 %1144 }
0x1317   :  { %v1150_v12 = vmul.f32 %v1782_v28, %v1145_v11 }
0x1318   :  { %v1147_v13 = vpop.permute.xlu0 %1146 }
0x1319   :  { %1154 = vrot.lane.b32.xlu1 %v1150_v12, %s1878_s1  ;;  %v1151_v14 = vmul.f32 %v1784_v29, %v1147_v13 }
0x131b   :  { %1156 = vrot.lane.b32.xlu0 %v1151_v14, %s1878_s1 }
0x138b   :  { %v1155_v16 = vpop.permute.xlu1 %1154 }
0x138c   :  { %v1160_v17 = vadd.f32 %v1155_v16, %v1140_v15 }
0x138d   :  { %v1157_v20 = vpop.permute.xlu0 %1156 }
0x138e   :  { %1785 = vtanh.f32 %v1160_v17  ;;  %v1161_v22 = vadd.f32 %v1157_v20, %v1141_v18 }
0x1390   :  { %1787 = vtanh.f32 %v1161_v22 }
0x1398   :  { %v1786_v23 = vpop.eup %1785 }
0x1399   :  { %1166 = vrot.lane.b32.xlu1 %v1786_v23, %s1877_s4 }
0x139a   :  { %v1788_v24 = vpop.eup %1787 }
0x139b   :  { %1168 = vrot.lane.b32.xlu0 %v1788_v24, %s1877_s4 }
0x140b   :  { %v1167_v25 = vpop.permute.xlu1 %1166 }
0x140c   :  { %v2218_v27 = vmul.f32 %v1782_v28, %v1167_v25 }
0x140d   :  { %v1169_v30 = vpop.permute.xlu0 %1168 }
0x140e   :  { %v2220_v33 = vmul.f32 %v1784_v29, %v1169_v30  ;;  %v1186_v26 = vpack.c.bf16 %v2218_v27, %v2218_v27 }
0x1410   :  { %v1187_v31 = vpack.c.bf16 %v2220_v33, %v2220_v33  ;;  %v1190_v37 = vunpack.c.l.b16 %v1186_v26 }
0x1412   :  { %v1191_v36 = vunpack.c.l.b16 %v1187_v31 }
0x1414   :  { %v1192_v40 = vrot.slane %v1191_v36, 7 }
0x1416   :  { %v1193_v41 = vsel %vm472_vm4, %v1192_v40, %v1190_v37 }
0x1417   :  { %v1194_v44 = vpack.c.b16 %v1193_v41, %v1193_v41 }
0x1419   :  { %1195 = vrot.lane.b32.xlu0 %v1194_v44, %s1878_s1 }
0x148b   :  { %v1196_v45 = vpop.permute.xlu0 %1195 }
0x148c   :  { %1631 = vmatmul.mubr.msk.bf16.vlgmr.msra.gmra.mrb[20].mxu1 %vm346_vm3, %v1196_v45 }
0x155f   :  { %v1234_v47 = vpop.f32.mrb[20].mxu1 }
0x1560   :  { %v1241_v48 = vrot.slane %v1234_v47, 1  ;;  %v1244_v50 = vadd.f32 %v1234_v47, %v1184_v46  ;;  %v1632_v51 = vpop.f32.mrb[21].mxu1 }
0x1561   :  { %v1237_v54 = vpop.f32.mrb[22].mxu1 }
0x1562   :  { %v1245_v55 = vadd.f32 %v1241_v48, %v1185_v53  ;;  %1789 = vtanh.f32 %v1244_v50  ;;  %v1633_v56 = vpop.f32.mrb[23].mxu1  ;;  %v1499_v61 = vmul.f32 -1.442695, %v1244_v50 }
0x1564   :  { %1791 = vtanh.f32 %v1245_v55  ;;  %v1500_v62 = vmul.f32 -1.442695, %v1245_v55 }
0x1565   :  { %1793 = vpow2.f32 %v1499_v61 }
0x1566   :  { %1795 = vpow2.f32 %v1500_v62 }
0x156c   :  { %v1790_v57 = vpop.eup %1789 }
0x156d   :  { %1264 = vrot.lane.b32.xlu1 %v1790_v57, %s1877_s4 }
0x156e   :  { %v1792_v59 = vpop.eup %1791 }
0x156f   :  { %1266 = vrot.lane.b32.xlu0 %v1792_v59, %s1877_s4  ;;  %v1794_v63 = vpop.eup %1793 }
0x1570   :  { %v1796_v0 = vpop.eup %1795  ;;  %v1252_v1 = vadd.f32 1.0, %v1794_v63 }
0x1571   :  { %v1253_v3 = vadd.f32 1.0, %v1796_v0 }
0x1572   :  { %1797 = vrcp.f32 %v1252_v1 }
0x1573   :  { %1799 = vrcp.f32 %v1253_v3 }
0x157c   :  { %v1798_v4 = vpop.eup %1797 }
0x157d   :  { %v1800_v9 = vpop.eup %1799  ;;  %v1260_v11 = vmul.f32 %v1798_v4, %v1160_v17 }
0x157e   :  { %v1261_v13 = vmul.f32 %v1800_v9, %v1161_v22 }
0x15df   :  { %v1265_v5 = vpop.permute.xlu1 %1264 }
0x15e0   :  { %v1270_v7 = vmul.f32 %v1798_v4, %v1265_v5 }
0x15e1   :  { %v1267_v10 = vpop.permute.xlu0 %1266 }
0x15e2   :  { %1274 = vrot.lane.b32.xlu1 %v1270_v7, %s1878_s1  ;;  %v1271_v28 = vmul.f32 %v1800_v9, %v1267_v10 }
0x15e4   :  { %1276 = vrot.lane.b32.xlu0 %v1271_v28, %s1878_s1 }
0x1654   :  { %v1275_v12 = vpop.permute.xlu1 %1274 }
0x1655   :  { %v1280_v29 = vadd.f32 %v1275_v12, %v1260_v11 }
0x1656   :  { %v1277_v14 = vpop.permute.xlu0 %1276 }
0x1657   :  { %1801 = vtanh.f32 %v1280_v29  ;;  %v1281_v15 = vadd.f32 %v1277_v14, %v1261_v13 }
0x1659   :  { %1803 = vtanh.f32 %v1281_v15  ;;  %v1313_v16 = vrot.slane %v1281_v15, 7 }
0x165b   :  { %v1314_v18 = vsel %vm472_vm4, %v1313_v16, %v1280_v29 }
0x1661   :  { %v1802_v20 = vpop.eup %1801 }
0x1662   :  { %1286 = vrot.lane.b32.xlu1 %v1802_v20, %s1877_s4 }
0x1663   :  { %v1804_v23 = vpop.eup %1803 }
0x1664   :  { %1288 = vrot.lane.b32.xlu0 %v1804_v23, %s1877_s4 }
0x1666   :  { %454 = vrot.lane.b32.xlu1 %v2088_v43, %s1878_s1  ;;  %v1676_v43 = vld [vmem:[%s2355_s5 + $0x8] sm:$0xff]  }
0x1668   :  { %456 = vrot.lane.b32.xlu0 %v2084_v39, %s1878_s1  ;;  %v1675_v39 = vld [vmem:[%s2355_s5] sm:$0xff]   ;;  %s1879_s5 = smov 96  }
0x1669   :  { %1635 = vmatpush3.bf16.msra.mxu0 %v1675_v39 }
0x166a   :  { %576 = vrot.lane.b32.xlu1 %v2108_v19, %s1878_s1  ;;  %1636 = vmatprep.subr.bf16.mxu0 %v1875_v2  ;;  %v43_v2 = vld [vmem:[%s2356_s6 + $0x1] sm:$0x3]  ;;  %s1880_s6 = smov [#allocation7]  }
0x166b   :  { %v1341_v17 = vrot.slane %v43_v2, %v246_v35  ;;  %s1423_s30 = sshll.u32 %s1880_s6, 4  ;;  %s1424_s30 = int_to_ptr.vmem [resolvable:$true] %s1423_s30 }
0x166c   :  { %578 = vrot.lane.b32.xlu0 %v2110_v21, %s1878_s1  ;;  %s1805_s10 = scalar_lea.vmem %s1424_s30, 256  ;;  %p1810_p1 = scmp.lt.s32.totalorder %s1424_s30, %s1424_s30 }
0x166d   :  { %1637 = vmatpush3.bf16.msra.mxu0 %v1676_v43  ;;  %p1806_p0 = scmp.ne.s32.totalorder %s1424_s30, %s1805_s10  ;;  %p1811_p2 = scmp.lt.s32.totalorder %s1805_s10, %s1805_s10 }
0x166e   :  { %696 = vrot.lane.b32.xlu1 %v2131_v6, %s1878_s1 }
0x166f   :  { %p1812_p3 = por %p1811_p2, %p1810_p1 }
0x1670   :  { %698 = vrot.lane.b32.xlu0 %v2133_v8, %s1878_s1 }
0x1671   :  { %p1813_p4 = pnand %p1812_p3, %p1806_p0 }
0x1672   :  { %816 = vrot.lane.b32.xlu1 %v2154_v58, %s1878_s1 }
0x1674   :  { %818 = vrot.lane.b32.xlu0 %v2156_v60, %s1878_s1 }
0x1676   :  { %936 = vrot.lane.b32.xlu1 %v2177_v49, %s1878_s1 }
0x1678   :  { %938 = vrot.lane.b32.xlu0 %v2179_v52, %s1878_s1 }
0x167a   :  { %1056 = vrot.lane.b32.xlu1 %v2199_v38, %s1878_s1 }
0x167c   :  { %1058 = vrot.lane.b32.xlu0 %v2201_v42, %s1878_s1  ;;  %v1337_v42 = vrot.slane %v43_v2, %v242_v34 }
0x167e   :  { %1176 = vrot.lane.b32.xlu1 %v2218_v27, %s1878_s1 }
0x1680   :  { %1178 = vrot.lane.b32.xlu0 %v2220_v33, %s1878_s1 }
0x16d4   :  { %v1287_v19 = vpop.permute.xlu1 %1286 }
0x16d5   :  { %v1292_v21 = vmul.f32 %v1798_v4, %v1287_v19 }
0x16d6   :  { %v1289_v6 = vpop.permute.xlu0 %1288 }
0x16d7   :  { %1296 = vrot.lane.b32.xlu1 %v1292_v21, %s1878_s1  ;;  %v1293_v8 = vmul.f32 %v1800_v9, %v1289_v6 }
0x16d8   :  { %v455_v58 = vpop.permute.xlu1 %454 }
0x16d9   :  { %461 = vst.msk [vmem:[#allocation3] sm:$0x1] %vm460_vm5, %v455_v58  ;;  %v1304_v60 = vrot.slane %v1293_v8, 7  ;;  %1298 = vrot.lane.b32.xlu0 %v1293_v8, %s1878_s1 }
0x16da   :  { %v457_v49 = vpop.permute.xlu0 %456 }
0x16db   :  { %462 = vst.msk [vmem:[#allocation3 + $0x8] sm:$0x1] %vm460_vm5, %v457_v49  ;;  %v1305_v38 = vsel %vm472_vm4, %v1304_v60, %v1292_v21 }
0x16dc   :  { %v577_v52 = vpop.permute.xlu1 %576  ;;  %1306 = vrot.lane.b32.xlu1 %v1305_v38, %s1878_s1 }
0x16dd   :  { %582 = vst.msk [vmem:[#allocation3 + $0x1] sm:$0x1] %vm460_vm5, %v577_v52  ;;  %1315 = vrot.lane.b32.xlu0 %v1314_v18, %s1879_s5 }
0x16de   :  { %v579_v22 = vpop.permute.xlu0 %578 }
0x16df   :  { %583 = vst.msk [vmem:[#allocation3 + $0x9] sm:$0x1] %vm460_vm5, %v579_v22 }
0x16e0   :  { %v697_v24 = vpop.permute.xlu1 %696  ;;  %1354 = vrot.lane.b32.xlu1 %v1337_v42, %s1877_s4 }
0x16e1   :  { %702 = vst.msk [vmem:[#allocation3 + $0x2] sm:$0x1] %vm460_vm5, %v697_v24  ;;  %1356 = vrot.lane.b32.xlu0 %v1341_v17, %s1877_s4 }
0x16e2   :  { %v699_v25 = vpop.permute.xlu0 %698 }
0x16e3   :  { %703 = vst.msk [vmem:[#allocation3 + $0xa] sm:$0x1] %vm460_vm5, %v699_v25 }
0x16e4   :  { %v817_v27 = vpop.permute.xlu1 %816 }
0x16e5   :  { %822 = vst.msk [vmem:[#allocation3 + $0x3] sm:$0x1] %vm460_vm5, %v817_v27 }
0x16e6   :  { %v819_v34 = vpop.permute.xlu0 %818 }
0x16e7   :  { %823 = vst.msk [vmem:[#allocation3 + $0xb] sm:$0x1] %vm460_vm5, %v819_v34 }
0x16e8   :  { %v937_v32 = vpop.permute.xlu1 %936 }
0x16e9   :  { %942 = vst.msk [vmem:[#allocation3 + $0x4] sm:$0x1] %vm460_vm5, %v937_v32 }
0x16ea   :  { %v939_v35 = vpop.permute.xlu0 %938 }
0x16eb   :  { %943 = vst.msk [vmem:[#allocation3 + $0xc] sm:$0x1] %vm460_vm5, %v939_v35 }
0x16ec   :  { %v1057_v30 = vpop.permute.xlu1 %1056 }
0x16ed   :  { %1062 = vst.msk [vmem:[#allocation3 + $0x5] sm:$0x1] %vm460_vm5, %v1057_v30 }
0x16ee   :  { %v1059_v33 = vpop.permute.xlu0 %1058 }
0x16ef   :  { %1063 = vst.msk [vmem:[#allocation3 + $0xd] sm:$0x1] %vm460_vm5, %v1059_v33 }
0x16f0   :  { %v1177_v26 = vpop.permute.xlu1 %1176 }
0x16f1   :  { %1182 = vst.msk [vmem:[#allocation3 + $0x6] sm:$0x1] %vm460_vm5, %v1177_v26 }
0x16f2   :  { %v1179_v31 = vpop.permute.xlu0 %1178 }
0x16f3   :  { %1183 = vst.msk [vmem:[#allocation3 + $0xe] sm:$0x1] %vm460_vm5, %v1179_v31 }
0x1749   :  { %v1297_v36 = vpop.permute.xlu1 %1296 }
0x174a   :  { %1302 = vst.msk [vmem:[#allocation3 + $0x7] sm:$0x1] %vm460_vm5, %v1297_v36 }
0x174b   :  { %v1299_v37 = vpop.permute.xlu0 %1298 }
0x174c   :  { %1303 = vst.msk [vmem:[#allocation3 + $0xf] sm:$0x1] %vm460_vm5, %v1299_v37 }
0x174e   :  { %v1307_v40 = vpop.permute.xlu1 %1306 }
0x174f   :  { %1310 = vst.msk [vmem:[#allocation4] sm:$0x3] %vm38_vm0, %v1307_v40  ;;  %v1316_v41 = vpop.permute.xlu0 %1315 }
0x1750   :  { %1318 = vst.msk [vmem:[#allocation4 + $0x2] sm:$0x3] %vm38_vm0, %v1316_v41 }
0x1751   :  { %v1326_v44 = vld [vmem:[#allocation3] sm:$0xff] }
0x1753   :  { %v1327_v45 = vld [vmem:[#allocation3 + $0x8] sm:$0xff] }
0x1754   :  { %v1328_v46 = vpack.c.bf16 %v1327_v45, %v1326_v44 }
0x1756   :  { %1639 = vmatmul.mubr.msk.bf16.vlgmr.msra.gmra.mrb[16].mxu0 %vm346_vm3, %v1328_v46  ;;  %v1322_v47 = vld [vmem:[#allocation4] sm:$0x3] }
0x1757   :  { %v1323_v48 = vld [vmem:[#allocation4 + $0x2] sm:$0x3]  ;;  %1324 = vst.msk [vmem:[#allocation9] sm:$0x3] %vm38_vm0, %v1322_v47 }
0x1758   :  { %1325 = vst.msk [vmem:[#allocation9 + $0x2] sm:$0x3] %vm38_vm0, %v1323_v48 }
0x1759   :  { %1816 = shalt.err (!%p1813_p4)
}
0x175a   :  { %s1817_s0 = scalar_lea.hbm %s2358_s8, 256 }
0x175b   :  { %p1818_p5 = scmp.ne.s32.totalorder %s2358_s8, %s1817_s0  ;;  %p1821_p6 = scmp.lt.u32.totalorder %s1817_s0, %s2358_s8 }
0x175d   :  { %p1823_p7 = pnand %p1821_p6, %p1818_p5 }
0x175f   :  { %1826 = shalt.err (!%p1823_p7)
}
0x1760   :  { %s1881_s16 = smov 128   ;;  %s1882_s3 = smov 8  }
0x1761   :  { %1429 = dma.vmem_to_hbm [thread:$0]  %s1424_s30, 256, %s2358_s8, [#allocation8], %s1881_s16, %s1881_s16, %s1882_s3  }
0x1762   :  { %s1883_s19 = smov [#allocation9]  }
0x1763   :  { %s1435_s20 = sshll.u32 %s1883_s19, 4  ;;  %s1436_s20 = int_to_ptr.vmem [resolvable:$true] %s1435_s20 }
0x1764   :  { %s1827_s21 = scalar_lea.vmem %s1436_s20, 64  ;;  %p1832_p9 = scmp.lt.s32.totalorder %s1436_s20, %s1436_s20 }
0x1765   :  { %p1828_p8 = scmp.ne.s32.totalorder %s1436_s20, %s1827_s21  ;;  %p1833_p10 = scmp.lt.s32.totalorder %s1827_s21, %s1827_s21 }
0x1767   :  { %p1834_p11 = por %p1833_p10, %p1832_p9 }
0x1769   :  { %p1835_p12 = pnand %p1834_p11, %p1828_p8 }
0x176b   :  { %1838 = shalt.err (!%p1835_p12)
}
0x176c   :  { %s1839_s23 = scalar_lea.hbm %s2359_s9, 64 }
0x176d   :  { %p1840_p13 = scmp.ne.s32.totalorder %s2359_s9, %s1839_s23  ;;  %p1843_p0 = scmp.lt.u32.totalorder %s1839_s23, %s2359_s9 }
0x176f   :  { %p1845_p1 = pnand %p1843_p0, %p1840_p13 }
0x1771   :  { %1848 = shalt.err (!%p1845_p1)
}
0x1772   :  { %s1884_s27 = smov 2   ;;  %v1355_v50 = vpop.permute.xlu1 %1354  ;;  %v1357_v51 = vpop.permute.xlu0 %1356  ;;  %s1885_s5 = smov [#allocation5]  }
0x1773   :  { %1441 = dma.vmem_to_hbm [thread:$0]  %s1436_s20, 64, %s2359_s9, [#allocation8], %s1878_s1, %s1878_s1, %s1884_s27   ;;  %v1358_v53 = vsel %vm227_vm2, %v1355_v50, %v1357_v51 }
0x1774   :  { %s1411_s6 = sshll.u32 %s1885_s5, 4  ;;  %s1412_s6 = int_to_ptr.vmem [resolvable:$true] %s1411_s6 }
0x1775   :  { %s1849_s30 = scalar_lea.vmem %s1412_s6, 256  ;;  %p1854_p3 = scmp.lt.s32.totalorder %s1412_s6, %s1412_s6 }
0x1776   :  { %p1850_p2 = scmp.ne.s32.totalorder %s1412_s6, %s1849_s30  ;;  %p1855_p4 = scmp.lt.s32.totalorder %s1849_s30, %s1849_s30 }
0x1778   :  { %p1856_p5 = por %p1855_p4, %p1854_p3 }
0x177a   :  { %p1857_p6 = pnand %p1856_p5, %p1850_p2 }
0x1829   :  { %v1397_v54 = vpop.f32.mrb[16].mxu0 }
0x182a   :  { %v1398_v55 = vadd.f32 %v1397_v54, %v1358_v53  ;;  %v1640_v56 = vpop.f32.mrb[17].mxu0 }
0x182b   :  { %v1400_v57 = vpop.f32.mrb[18].mxu0 }
0x182c   :  { %1404 = vst [vmem:[#allocation5] sm:$0xff] %v1398_v55  ;;  %v1401_v59 = vadd.f32 %v1400_v57, %v1358_v53  ;;  %v1641_v61 = vpop.f32.mrb[19].mxu0 }
0x182e   :  { %1405 = vst [vmem:[#allocation5 + $0x8] sm:$0xff] %v1401_v59 }
0x182f   :  { %1860 = shalt.err (!%p1857_p6)
}
0x1830   :  { %s1861_s10 = scalar_lea.hbm %s2357_s7, 256 }
0x1831   :  { %p1862_p7 = scmp.ne.s32.totalorder %s2357_s7, %s1861_s10  ;;  %p1865_p8 = scmp.lt.u32.totalorder %s1861_s10, %s2357_s7 }
0x1833   :  { %p1867_p9 = pnand %p1865_p8, %p1862_p7 }
0x1835   :  { %1870 = shalt.err (!%p1867_p9)
}
0x1836   :  { %1417 = dma.vmem_to_hbm [thread:$0]  %s1412_s6, 256, %s2357_s7, [#allocation6], %s1881_s16, %s1881_s16, %s1882_s3  }
0x1837   :  { %1871 = dma.done.wait [#allocation6], 256  }
0x1838   :  { %1872 = vsyncadd [#allocation6], 4294967040 }
0x1839   :  { %1873 = dma.done.wait [#allocation8], 320  }
0x183a   :  { %1874 = vsyncadd [#allocation8], 4294966976 }
0x183b   :  { %1451 = vsyncpa [#allocation6], 1 }
0x183c   :  { %1452 = vsyncpa [#allocation8], 1 }

</bundles_post_ra>
